<compile_context>
chip_gen: v6e
topology: v6e:2x2x1
jax: 0.10.0
libtpu: 0.0.40
codegen_flags: <defaults>
</compile_context>

<pallas_src>
import jax
import jax.numpy as jnp
from jax.experimental import pallas as pl
from jax.experimental.pallas import tpu as pltpu

INPUT_SIZE = 784
LABEL_SIZE = 10
HIDDEN = 200
NUM_CLASSES = 1

_MAX_TILE = 1024   # rows per batch tile (f32 x-tile = 3.2 MiB, double-buffered)
_MIN_TILE = 16     # bf16 sublane packing: 16 rows per packed vreg


def _round_up(n, m):
    return ((n + m - 1) // m) * m


def _pick_batch_tile(b):
    """Batch-tile heuristic: tiles big enough to amortize the ~0.35 us/step
    pipeline overhead, an even number of grid steps so both v7x TensorCores
    get work, and a multiple of 16 rows for bf16 sublane packing."""
    if b <= 2 * _MIN_TILE:
        return _round_up(b, _MIN_TILE)                       # tiny batch: one tile
    n_tiles = max(2, 2 * pl.cdiv(pl.cdiv(b, _MAX_TILE), 2))  # even, >= 2
    return _round_up(pl.cdiv(b, n_tiles), _MIN_TILE)


def _disc_kernel(x_ref, y_ref, w1x_ref, w1y_ref, b1_ref, w2_ref, b2_ref,
                 w3r_ref, b3_ref, o_ref):
    """One batch tile of the MLP forward. Weights are VMEM-resident across tiles."""
    # f32 -> bf16 cast in-kernel (VALU slack); keeps the HBM activation stream
    # f32 and avoids a standalone XLA convert pass before the kernel.
    xb = x_ref[...].astype(jnp.bfloat16)                       # (Bt, 784)
    yb = y_ref[...].astype(jnp.bfloat16)                       # (Bt, 10)

    # layer1: Linear(784+10 -> 200) split into image/label parts, + bias, ReLU.
    h1 = (jnp.dot(xb, w1x_ref[...], preferred_element_type=jnp.float32)
          + jnp.dot(yb, w1y_ref[...], preferred_element_type=jnp.float32)
          + b1_ref[...])
    h1 = jnp.maximum(h1, 0.0)                                  # (Bt, 200) f32

    # layer2: Linear(200 -> 200) + ReLU. (Dropout == identity in eval mode.)
    h2 = jnp.dot(h1.astype(jnp.bfloat16), w2_ref[...],
                 preferred_element_type=jnp.float32) + b2_ref[...]
    h2 = jnp.maximum(h2, 0.0)                                  # (Bt, 200) f32

    # layer3: Linear(200 -> 1) + Sigmoid.
    # N=1 matmul would waste the MXU; VPU multiply + lane reduction instead.
    logits = jnp.sum(h2 * w3r_ref[...], axis=-1, keepdims=True) + b3_ref[...]
    # Sigmoid with the divide pushed onto the EUP (exp already lives there).
    o_ref[...] = pl.reciprocal(1.0 + jnp.exp(-logits),
                               approx=True).astype(o_ref.dtype)  # (Bt, 1)


def discriminator_forward(x, y, params, *, block_b=None):
    """x: (B, 1, 28, 28) or (B, 784) float32; y: (B, 10) float32.
    Returns (B, 1) float32."""
    b = x.shape[0]
    x_flat = x.reshape(b, -1)      # (B, 784) f32 — no host-side dtype convert
    y_flat = y.reshape(b, -1)      # (B, 10)  f32
    assert x_flat.shape[1] == INPUT_SIZE and y_flat.shape[1] == LABEL_SIZE

    if block_b is None:
        bt = _pick_batch_tile(b)
    else:
        bt = _round_up(min(block_b, b), _MIN_TILE)
    grid = (pl.cdiv(b, bt),)

    def act_spec(cols):
        return pl.BlockSpec((bt, cols), lambda i: (i, 0))

    def resident(shape):           # constant index_map: DMA'd once, VMEM-resident
        return pl.BlockSpec(shape, lambda i: (0, 0))

    flops = 2 * b * (INPUT_SIZE * HIDDEN + LABEL_SIZE * HIDDEN
                     + HIDDEN * HIDDEN + HIDDEN)
    bytes_accessed = (b * (INPUT_SIZE + LABEL_SIZE) * 4        # f32 activation stream
                      + b * NUM_CLASSES * 4                    # f32 output
                      + ((INPUT_SIZE + LABEL_SIZE) * HIDDEN + HIDDEN * HIDDEN) * 2
                      + (2 * HIDDEN + HIDDEN + NUM_CLASSES) * 4)

    out = pl.pallas_call(
        _disc_kernel,
        out_shape=jax.ShapeDtypeStruct((b, NUM_CLASSES), jnp.float32),
        grid=grid,
        in_specs=[
            act_spec(INPUT_SIZE),                              # x tile    (Bt, 784) f32
            act_spec(LABEL_SIZE),                              # y tile    (Bt, 10)  f32
            resident((INPUT_SIZE, HIDDEN)),                    # w1x       (784, 200) bf16
            resident((LABEL_SIZE, HIDDEN)),                    # w1y       (10, 200)  bf16
            resident((1, HIDDEN)),                             # b1        (1, 200)   f32
            resident((HIDDEN, HIDDEN)),                        # w2        (200, 200) bf16
            resident((1, HIDDEN)),                             # b2        (1, 200)   f32
            resident((1, HIDDEN)),                             # w3 row    (1, 200)   f32
            resident((1, NUM_CLASSES)),                        # b3        (1, 1)     f32
        ],
        out_specs=pl.BlockSpec((bt, NUM_CLASSES), lambda i: (i, 0)),
        compiler_params=pltpu.CompilerParams(
            dimension_semantics=("parallel",)),                # megacore split on v7x
        cost_estimate=pl.CostEstimate(
            flops=flops, transcendentals=2 * b, bytes_accessed=bytes_accessed),
    )(x_flat, y_flat, params["w1x"], params["w1y"], params["b1"],
      params["w2"], params["b2"], params["w3_row"], params["b3"])
    return out


def init_params(key):
    """PyTorch-Linear-style uniform(+-1/sqrt(fan_in)) init.
    Matmul weights are stored (in_features, out_features) in bf16; the final
    layer weight is stored as a lane-dense (1, 200) f32 row."""
    ks = jax.random.split(key, 6)

    def uniform(k, shape, fan_in, dtype):
        bound = 1.0 / (fan_in ** 0.5)
        return jax.random.uniform(k, shape, jnp.float32, -bound, bound).astype(dtype)

    fan1 = INPUT_SIZE + LABEL_SIZE
    w1 = uniform(ks[0], (fan1, HIDDEN), fan1, jnp.bfloat16)
    return {
        "w1x": w1[:INPUT_SIZE],                                 # (784, 200) bf16
        "w1y": w1[INPUT_SIZE:],                                 # (10, 200)  bf16
        "b1": uniform(ks[1], (1, HIDDEN), fan1, jnp.float32),
        "w2": uniform(ks[2], (HIDDEN, HIDDEN), HIDDEN, jnp.bfloat16),
        "b2": uniform(ks[3], (1, HIDDEN), HIDDEN, jnp.float32),
        "w3_row": uniform(ks[4], (1, HIDDEN), HIDDEN, jnp.float32),
        "b3": uniform(ks[5], (1, NUM_CLASSES), HIDDEN, jnp.float32),
    }


def _reference_forward(x, y, params):
    """Pure-JAX reference using the same bf16 weights / f32 accumulation."""
    b = x.shape[0]
    xf = x.reshape(b, -1).astype(jnp.bfloat16)
    yf = y.reshape(b, -1).astype(jnp.bfloat16)
    h1 = jax.nn.relu(
        jnp.dot(xf, params["w1x"], preferred_element_type=jnp.float32)
        + jnp.dot(yf, params["w1y"], preferred_element_type=jnp.float32)
        + params["b1"])
    h2 = jax.nn.relu(
        jnp.dot(h1.astype(jnp.bfloat16), params["w2"],
                preferred_element_type=jnp.float32) + params["b2"])
    logits = jnp.sum(h2 * params["w3_row"], axis=-1, keepdims=True) + params["b3"]
    return jax.nn.sigmoid(logits)


if __name__ == "__main__":
    key = jax.random.PRNGKey(0)
    k_x, k_y, k_p = jax.random.split(key, 3)

    # x is image-shaped NCHW (B, 1, 28, 28); y is one-hot labels (B, 10).
    # B=256 -> auto tile of 128 rows x 2 grid steps: exercises the batch grid
    # and the even-step megacore split while staying small.
    B = 256
    x = jax.random.normal(k_x, (B, 1, 28, 28), jnp.float32)
    labels = jax.random.randint(k_y, (B,), 0, LABEL_SIZE)
    y = jax.nn.one_hot(labels, LABEL_SIZE, dtype=jnp.float32)

    params = init_params(k_p)

    out = jax.block_until_ready(discriminator_forward(x, y, params))
    ref = _reference_forward(x, y, params)

    assert out.shape == (B, NUM_CLASSES), out.shape
    assert bool(jnp.all(jnp.isfinite(out)))
    max_err = float(jnp.max(jnp.abs(out - ref)))
    # bf16 weights + EUP-approx reciprocal in the sigmoid => ~1e-3-level
    # deviation from a pure-f32 PyTorch forward (mirrored in the reference).
    assert max_err < 3e-3, max_err

    print("KERNEL_OK")
</pallas_src>

<mosaic_0001>
module attributes {stable_mosaic.version = 11 : i64} {
  func.func @_disc_kernel(%arg0: i32, %arg1: memref<128x784xf32, #tpu.memory_space<vmem>>, %arg2: memref<128x10xf32, #tpu.memory_space<vmem>>, %arg3: memref<784x200xbf16, #tpu.memory_space<vmem>>, %arg4: memref<10x200xbf16, #tpu.memory_space<vmem>>, %arg5: memref<1x200xf32, #tpu.memory_space<vmem>>, %arg6: memref<200x200xbf16, #tpu.memory_space<vmem>>, %arg7: memref<1x200xf32, #tpu.memory_space<vmem>>, %arg8: memref<1x200xf32, #tpu.memory_space<vmem>>, %arg9: memref<1x1xf32, #tpu.memory_space<vmem>>, %arg10: memref<128x1xf32, #tpu.memory_space<vmem>>) attributes {dimension_semantics = [#tpu.dimension_semantics<parallel>], iteration_bounds = array<i64: 2>, scalar_prefetch = 0 : i64, scratch_operands = 0 : i64, tpu.core_type = #tpu.core_type<tc>, window_params = [{transform_indices = @transform_0, window_bounds = array<i64: 128, 784>}, {transform_indices = @transform_1, window_bounds = array<i64: 128, 10>}, {pipeline_mode = #tpu.pipeline_mode<synchronous>, transform_indices = @transform_2, window_bounds = array<i64: 784, 200>}, {pipeline_mode = #tpu.pipeline_mode<synchronous>, transform_indices = @transform_3, window_bounds = array<i64: 10, 200>}, {pipeline_mode = #tpu.pipeline_mode<synchronous>, transform_indices = @transform_4, window_bounds = array<i64: 1, 200>}, {pipeline_mode = #tpu.pipeline_mode<synchronous>, transform_indices = @transform_5, window_bounds = array<i64: 200, 200>}, {pipeline_mode = #tpu.pipeline_mode<synchronous>, transform_indices = @transform_6, window_bounds = array<i64: 1, 200>}, {pipeline_mode = #tpu.pipeline_mode<synchronous>, transform_indices = @transform_7, window_bounds = array<i64: 1, 200>}, {pipeline_mode = #tpu.pipeline_mode<synchronous>, transform_indices = @transform_8, window_bounds = array<i64: 1, 1>}, {transform_indices = @transform_9, window_bounds = array<i64: 128, 1>}]} {
    %c0 = arith.constant 0 : index
    %c0_0 = arith.constant 0 : index
    %0 = vector.load %arg1[%c0, %c0_0] : memref<128x784xf32, #tpu.memory_space<vmem>>, vector<128x784xf32>
    %1 = arith.truncf %0 : vector<128x784xf32> to vector<128x784xbf16>
    %c0_1 = arith.constant 0 : index
    %c0_2 = arith.constant 0 : index
    %2 = vector.load %arg2[%c0_1, %c0_2] : memref<128x10xf32, #tpu.memory_space<vmem>>, vector<128x10xf32>
    %3 = arith.truncf %2 : vector<128x10xf32> to vector<128x10xbf16>
    %c0_3 = arith.constant 0 : index
    %c0_4 = arith.constant 0 : index
    %4 = vector.load %arg3[%c0_3, %c0_4] : memref<784x200xbf16, #tpu.memory_space<vmem>>, vector<784x200xbf16>
    %cst = arith.constant dense<0.000000e+00> : vector<128x200xf32>
    %5 = tpu.matmul %1, %4, %cst {dimension_numbers = #tpu.dot_dimension_numbers<[1], [0], [0], [1], [0, 0, 1, 1], [], []>} : vector<128x784xbf16>, vector<784x200xbf16>, vector<128x200xf32> -> vector<128x200xf32>
    %c0_5 = arith.constant 0 : index
    %c0_6 = arith.constant 0 : index
    %6 = vector.load %arg4[%c0_5, %c0_6] : memref<10x200xbf16, #tpu.memory_space<vmem>>, vector<10x200xbf16>
    %cst_7 = arith.constant dense<0.000000e+00> : vector<128x200xf32>
    %7 = tpu.matmul %3, %6, %cst_7 {dimension_numbers = #tpu.dot_dimension_numbers<[1], [0], [0], [1], [0, 0, 1, 1], [], []>} : vector<128x10xbf16>, vector<10x200xbf16>, vector<128x200xf32> -> vector<128x200xf32>
    %8 = arith.addf %5, %7 : vector<128x200xf32>
    %c0_8 = arith.constant 0 : index
    %c0_9 = arith.constant 0 : index
    %9 = vector.load %arg5[%c0_8, %c0_9] : memref<1x200xf32, #tpu.memory_space<vmem>>, vector<1x200xf32>
    %10 = vector.broadcast %9 : vector<1x200xf32> to vector<128x200xf32>
    %11 = arith.addf %8, %10 : vector<128x200xf32>
    %cst_10 = arith.constant 0.000000e+00 : f32
    %12 = vector.broadcast %cst_10 : f32 to vector<128x200xf32>
    %13 = arith.maximumf %11, %12 : vector<128x200xf32>
    %14 = arith.truncf %13 : vector<128x200xf32> to vector<128x200xbf16>
    %c0_11 = arith.constant 0 : index
    %c0_12 = arith.constant 0 : index
    %15 = vector.load %arg6[%c0_11, %c0_12] : memref<200x200xbf16, #tpu.memory_space<vmem>>, vector<200x200xbf16>
    %cst_13 = arith.constant dense<0.000000e+00> : vector<128x200xf32>
    %16 = tpu.matmul %14, %15, %cst_13 {dimension_numbers = #tpu.dot_dimension_numbers<[1], [0], [0], [1], [0, 0, 1, 1], [], []>} : vector<128x200xbf16>, vector<200x200xbf16>, vector<128x200xf32> -> vector<128x200xf32>
    %c0_14 = arith.constant 0 : index
    %c0_15 = arith.constant 0 : index
    %17 = vector.load %arg7[%c0_14, %c0_15] : memref<1x200xf32, #tpu.memory_space<vmem>>, vector<1x200xf32>
    %18 = vector.broadcast %17 : vector<1x200xf32> to vector<128x200xf32>
    %19 = arith.addf %16, %18 : vector<128x200xf32>
    %cst_16 = arith.constant 0.000000e+00 : f32
    %20 = vector.broadcast %cst_16 : f32 to vector<128x200xf32>
    %21 = arith.maximumf %19, %20 : vector<128x200xf32>
    %c0_17 = arith.constant 0 : index
    %c0_18 = arith.constant 0 : index
    %22 = vector.load %arg8[%c0_17, %c0_18] : memref<1x200xf32, #tpu.memory_space<vmem>>, vector<1x200xf32>
    %23 = vector.broadcast %22 : vector<1x200xf32> to vector<128x200xf32>
    %24 = arith.mulf %21, %23 : vector<128x200xf32>
    %cst_19 = arith.constant dense<0.000000e+00> : vector<128xf32>
    %25 = vector.multi_reduction <add>, %24, %cst_19 [1] : vector<128x200xf32> to vector<128xf32>
    %26 = vector.shape_cast %25 : vector<128xf32> to vector<128x1xf32>
    %c0_20 = arith.constant 0 : index
    %c0_21 = arith.constant 0 : index
    %27 = vector.load %arg9[%c0_20, %c0_21] : memref<1x1xf32, #tpu.memory_space<vmem>>, vector<1x1xf32>
    %28 = vector.broadcast %27 : vector<1x1xf32> to vector<128x1xf32>
    %29 = arith.addf %26, %28 : vector<128x1xf32>
    %cst_22 = arith.constant 0.000000e+00 : f32
    %30 = vector.broadcast %cst_22 : f32 to vector<128x1xf32>
    %31 = arith.subf %30, %29 : vector<128x1xf32>
    %32 = math.exp %31 : vector<128x1xf32>
    %cst_23 = arith.constant 1.000000e+00 : f32
    %33 = vector.broadcast %cst_23 : f32 to vector<128x1xf32>
    %34 = arith.addf %33, %32 : vector<128x1xf32>
    %35 = tpu.reciprocal %34 {approx = true} : vector<128x1xf32> -> vector<128x1xf32>
    %c0_24 = arith.constant 0 : index
    %c0_25 = arith.constant 0 : index
    %36 = vector.load %arg10[%c0_24, %c0_25] : memref<128x1xf32, #tpu.memory_space<vmem>>, vector<128x1xf32>
    tpu.vector_store %arg10[%c0_24, %c0_25], %35 {strides = array<i32>} : memref<128x1xf32, #tpu.memory_space<vmem>>, vector<128x1xf32>,
    return
  }
  func.func @transform_0(%arg0: i32) -> (i32, i32) {
    %c0_i32 = arith.constant 0 : i32
    %c0_i32_0 = arith.constant 0 : i32
    return %arg0, %c0_i32 : i32, i32
  }
  func.func @transform_1(%arg0: i32) -> (i32, i32) {
    %c0_i32 = arith.constant 0 : i32
    %c0_i32_0 = arith.constant 0 : i32
    return %arg0, %c0_i32 : i32, i32
  }
  func.func @transform_2(%arg0: i32) -> (i32, i32) {
    %c0_i32 = arith.constant 0 : i32
    %c0_i32_0 = arith.constant 0 : i32
    %c0_i32_1 = arith.constant 0 : i32
    return %c0_i32, %c0_i32_0 : i32, i32
  }
  func.func @transform_3(%arg0: i32) -> (i32, i32) {
    %c0_i32 = arith.constant 0 : i32
    %c0_i32_0 = arith.constant 0 : i32
    %c0_i32_1 = arith.constant 0 : i32
    return %c0_i32, %c0_i32_0 : i32, i32
  }
  func.func @transform_4(%arg0: i32) -> (i32, i32) {
    %c0_i32 = arith.constant 0 : i32
    %c0_i32_0 = arith.constant 0 : i32
    %c0_i32_1 = arith.constant 0 : i32
    return %c0_i32, %c0_i32_0 : i32, i32
  }
  func.func @transform_5(%arg0: i32) -> (i32, i32) {
    %c0_i32 = arith.constant 0 : i32
    %c0_i32_0 = arith.constant 0 : i32
    %c0_i32_1 = arith.constant 0 : i32
    return %c0_i32, %c0_i32_0 : i32, i32
  }
  func.func @transform_6(%arg0: i32) -> (i32, i32) {
    %c0_i32 = arith.constant 0 : i32
    %c0_i32_0 = arith.constant 0 : i32
    %c0_i32_1 = arith.constant 0 : i32
    return %c0_i32, %c0_i32_0 : i32, i32
  }
  func.func @transform_7(%arg0: i32) -> (i32, i32) {
    %c0_i32 = arith.constant 0 : i32
    %c0_i32_0 = arith.constant 0 : i32
    %c0_i32_1 = arith.constant 0 : i32
    return %c0_i32, %c0_i32_0 : i32, i32
  }
  func.func @transform_8(%arg0: i32) -> (i32, i32) {
    %c0_i32 = arith.constant 0 : i32
    %c0_i32_0 = arith.constant 0 : i32
    %c0_i32_1 = arith.constant 0 : i32
    return %c0_i32, %c0_i32_0 : i32, i32
  }
  func.func @transform_9(%arg0: i32) -> (i32, i32) {
    %c0_i32 = arith.constant 0 : i32
    %c0_i32_0 = arith.constant 0 : i32
    return %arg0, %c0_i32 : i32, i32
  }
}

</mosaic_0001>

<bundles_post_ra>
// kernel: tpu_custom_call.1
= control target key start
LH: loop header
LB: loop body
LE: loop exit
PB: predicated region body
PF: predicated region fallthrough
CT: control target
= control target key end

     0   :  { %s3051_s11 = smov 0   ;;  %s4058_s0 = inlined_call_operand.vmem [shape: f32[256,784], index: 0, kind: input, shape index: {}]   ;;  %s4059_s1 = inlined_call_operand.vmem [shape: f32[256,10], index: 1, kind: input, shape index: {}]   ;;  %s4060_s2 = inlined_call_operand.vmem [shape: bf16[784,200], index: 2, kind: input, shape index: {}]   ;;  %s4061_s3 = inlined_call_operand.vmem [shape: bf16[10,200], index: 3, kind: input, shape index: {}]   ;;  %s4062_s4 = inlined_call_operand.vmem [shape: f32[1,200], index: 4, kind: input, shape index: {}]   ;;  %s4063_s5 = inlined_call_operand.vmem [shape: bf16[200,200], index: 5, kind: input, shape index: {}]   ;;  %s4064_s6 = inlined_call_operand.vmem [shape: f32[1,200], index: 6, kind: input, shape index: {}]   ;;  %s4065_s7 = inlined_call_operand.vmem [shape: f32[1,200], index: 7, kind: input, shape index: {}]   ;;  %s4066_s8 = inlined_call_operand.<no memory space> [shape: f32[1,1], index: 8, kind: input, shape index: {}]   ;;  %s4067_s9 = inlined_call_operand.vmem [shape: f32[256,1], index: 9, kind: output, shape index: {}]  }
   0x1   :  { %v14_v0 = vstv %s4066_s8 }
   0x2   :  { %15 = vst [vmem:[#allocation2] sm:$0x1] %v14_v0 }
   0x3 LB: > { %s2503_s12 = sadd.s32 4294967295, %s2995_s11   ;;  %p2507_p0 = scmp.ge.s32.totalorder %s2995_s11, 1  ;;  %s2995_s11 = sphi %s3051_s11, %s21_s11  }
   0x4   : > { %p302_p1 = scmp.lt.s32.totalorder %s2995_s11, 3 }
   0x6   : > { %p303_p2 = pnand %p2507_p0, %p302_p1 }
   0x7   : > { %s2508_s16 = sshll.u32 (!%p303_p2), %s2503_s12, 4 }
   0x8   : > { %306 = sbr.rel (%p303_p2) target bundleno = 805 (0x325), region = 56  ;;  %p345_p3 = scmp.lt.s32.totalorder (!%p303_p2), %s2508_s16, 31 }
   0xd   : > { %v2737_v1 = vld [vmem:[%s4060_s2 + $0x74] ss:$8 sps:$4 sm:$0xff]   ;;  %vm689_vm0 = vcmask 1044480   ;;  %v2739_v2 = vld [vmem:[%s4060_s2 + $0x70] ss:$8 sps:$4 sm:$0xff]   ;;  %v2997_v3 = vmov 0  }
   0xe   : > { %728 = vmatprep.mubr.bf16.mxu0 %v2997_v3  ;;  %1324 = vmatprep.subr.bf16.mxu1 %v2737_v1  ;;  %v2740_v4 = vld [vmem:[%s4061_s3 + $0x4] ss:$8 sps:$4 sm:$0x1f]   ;;  %v2742_v5 = vld [vmem:[%s4061_s3] ss:$8 sps:$4 sm:$0x1f]  }
   0xf   : > { %1325 = vmatpush1.bf16.msra.mxu1 %v2739_v2  ;;  %v2743_v6 = vld [vmem:[%s4060_s2 + $0x64] ss:$8 sps:$4 sm:$0xff]   ;;  %2516 = vmatprep.subr.msk.bf16.mxu0 %vm689_vm0, %v2740_v4  ;;  %v691_v7 = vsel %vm689_vm0, %v2742_v5, 0  ;;  %v2745_v8 = vld [vmem:[%s4060_s2 + $0x60] ss:$8 sps:$4 sm:$0xff]   ;;  %s4069_s16 = smov (!%p345_p3, %s2508_s16), 31 }
  0x10   : > { %711 = vmatpush1.bf16.msra.mxu0 %v691_v7  ;;  %1326 = vmatprep.subr.bf16.mxu1 %v2743_v6  ;;  %v2748_v9 = vld [vmem:[%s4060_s2 + $0x174] ss:$8 sps:$4 sm:$0xff]   ;;  %s2511_s29 = sshll.u32 %s4069_s16, 3  ;;  %v2751_v11 = vld [vmem:[%s4060_s2 + $0x50] ss:$8 sps:$4 sm:$0xff]   ;;  %vm664_vm1 = vcmask 80896  }
  0x11   : > { %v2749_v10 = vld [vmem:[%s4060_s2 + $0x54] ss:$8 sps:$4 sm:$0xff]   ;;  %1437 = vmatprep.subr.bf16.mxu0 %v2748_v9  ;;  %v2746_v12 = vld [vmem:[%s4060_s2 + $0x170] ss:$8 sps:$4 sm:$0xff]   ;;  %s3098_s15 = scalar_lea.vmem %s4059_s1, %s2511_s29  ;;  %v2755_v15 = vld [vmem:[%s4060_s2 + $0x44] ss:$8 sps:$4 sm:$0xff]   ;;  %s4014_s25 = scalar_lea.vmem %s4067_s9, %s2511_s29 }
  0x12   : > { %v532_v13 = vld [vmem:[%s3098_s15] sm:$0xff]  ;;  %v533_v14 = vld [vmem:[%s3098_s15 + $0x8] sm:$0xff]  ;;  %v534_v20 = vld [vmem:[%s3098_s15 + $0x10] sm:$0xff]  ;;  %s2727_s27 = smul.u32 56, %s4069_s16  ;;  %vm1299_vm2 = vcmask 130048   ;;  %vm2055_vm3 = vcmask 1043456  }
  0x13   : > { %1327 = vmatpush1.bf16.msra.mxu1 %v2745_v8  ;;  %v548_v16 = vpack.c.bf16 %v533_v14, %v532_v13  ;;  %v2754_v17 = vld [vmem:[%s4060_s2 + $0x164] ss:$8 sps:$4 sm:$0xff]   ;;  %v2752_v18 = vld [vmem:[%s4060_s2 + $0x160] ss:$8 sps:$4 sm:$0xff]   ;;  %v535_v21 = vld [vmem:[%s3098_s15 + $0x18] sm:$0xff]  ;;  %vm2030_vm4 = vcmask 588800  }
  0x14   : > { %1328 = vmatprep.subr.bf16.mxu1 %v2749_v10  ;;  %v2757_v19 = vld [vmem:[%s4060_s2 + $0x40] ss:$8 sps:$4 sm:$0xff]   ;;  %v2761_v22 = vld [vmem:[%s4060_s2 + $0x34] ss:$8 sps:$4 sm:$0xff]   ;;  %v2763_v24 = vld [vmem:[%s4060_s2 + $0x30] ss:$8 sps:$4 sm:$0xff]   ;;  %v549_v25 = vpack.c.bf16 %v535_v21, %v534_v20  ;;  %s3235_s22 = scalar_lea.vmem %s4058_s0, %s2727_s27 }
  0x15   : > { %2517 = vmatmul.mubr.msk.bf16.vlgmr.msra.gmra.mxu0 %vm664_vm1, %v548_v16  ;;  %v2760_v23 = vld [vmem:[%s4060_s2 + $0x154] ss:$8 sps:$4 sm:$0xff]   ;;  %v2767_v26 = vld [vmem:[%s4060_s2 + $0x24] ss:$8 sps:$4 sm:$0xff]   ;;  %v2758_v27 = vld [vmem:[%s4060_s2 + $0x150] ss:$8 sps:$4 sm:$0xff]  }
  0x16   : > { %1438 = vmatpush1.bf16.msra.mxu0 %v2746_v12  ;;  %738 = vmatprep.mubr.bf16.mxu0 %v2997_v3  ;;  %v2766_v28 = vld [vmem:[%s4060_s2 + $0x144] ss:$8 sps:$4 sm:$0xff]   ;;  %v2764_v29 = vld [vmem:[%s4060_s2 + $0x140] ss:$8 sps:$4 sm:$0xff]   ;;  %v2773_v32 = vld [vmem:[%s4060_s2 + $0x14] ss:$8 sps:$4 sm:$0xff]  }
  0x17   : > { %1329 = vmatpush1.bf16.msra.mxu1 %v2751_v11  ;;  %1439 = vmatprep.subr.bf16.mxu0 %v2754_v17  ;;  %v2769_v30 = vld [vmem:[%s4060_s2 + $0x20] ss:$8 sps:$4 sm:$0xff]   ;;  %v2772_v34 = vld [vmem:[%s4060_s2 + $0x134] ss:$8 sps:$4 sm:$0xff]   ;;  %v2775_v35 = vld [vmem:[%s4060_s2 + $0x10] ss:$8 sps:$4 sm:$0xff]  }
  0x18   : > { %1330 = vmatprep.subr.bf16.mxu1 %v2755_v15  ;;  %v536_v31 = vld [vmem:[%s3098_s15 + $0x20] sm:$0xff]  ;;  %v537_v33 = vld [vmem:[%s3098_s15 + $0x28] sm:$0xff]  ;;  %v2770_v38 = vld [vmem:[%s4060_s2 + $0x130] ss:$8 sps:$4 sm:$0xff]   ;;  %vm2418_vm5 = vcmask 7168  }
  0x19   : > { %v550_v36 = vpack.c.bf16 %v537_v33, %v536_v31  ;;  %v2779_v37 = vld [vmem:[%s4060_s2 + $0x4] ss:$8 sps:$4 sm:$0xff]   ;;  %v2781_v40 = vld [vmem:[%s4060_s2] ss:$8 sps:$4 sm:$0xff]   ;;  %v2785_v41 = vld [vmem:[%s4060_s2 + $0xf4] ss:$8 sps:$4 sm:$0xff]  }
  0x1a   : > { %1440 = vmatpush1.bf16.msra.mxu0 %v2752_v18  ;;  %v2778_v39 = vld [vmem:[%s4060_s2 + $0x124] ss:$8 sps:$4 sm:$0xff]   ;;  %v2776_v42 = vld [vmem:[%s4060_s2 + $0x120] ss:$8 sps:$4 sm:$0xff]   ;;  %v538_v43 = vld [vmem:[%s3098_s15 + $0x30] sm:$0xff] }
  0x1b   : > { %1331 = vmatpush1.bf16.msra.mxu1 %v2757_v19  ;;  %1441 = vmatprep.subr.bf16.mxu0 %v2760_v23  ;;  %v539_v44 = vld [vmem:[%s3098_s15 + $0x38] sm:$0xff]  ;;  %v2791_v48 = vld [vmem:[%s4060_s2 + $0xe4] ss:$8 sps:$4 sm:$0xff]   ;;  %v2788_v51 = vld [vmem:[%s4060_s2 + $0x100] ss:$8 sps:$4 sm:$0xff]  }
  0x1c   : > { %1332 = vmatprep.subr.bf16.mxu1 %v2761_v22  ;;  %v2784_v45 = vld [vmem:[%s4060_s2 + $0x114] ss:$8 sps:$4 sm:$0xff]   ;;  %v2787_v46 = vld [vmem:[%s4060_s2 + $0xf0] ss:$8 sps:$4 sm:$0xff]   ;;  %v551_v47 = vpack.c.bf16 %v539_v44, %v538_v43  ;;  %v2790_v50 = vld [vmem:[%s4060_s2 + $0x104] ss:$8 sps:$4 sm:$0xff]  }
  0x1d   : > { %2518 = vmatmul.mubr.msk.bf16.gmra.mxu0 %vm664_vm1, %v549_v25  ;;  %v2782_v49 = vld [vmem:[%s4060_s2 + $0x110] ss:$8 sps:$4 sm:$0xff]   ;;  %v2793_v52 = vld [vmem:[%s4060_s2 + $0xe0] ss:$8 sps:$4 sm:$0xff]   ;;  %v2797_v53 = vld [vmem:[%s4060_s2 + $0xd4] ss:$8 sps:$4 sm:$0xff]  }
  0x1e   : > { %1442 = vmatpush1.bf16.msra.mxu0 %v2758_v27  ;;  %748 = vmatprep.mubr.bf16.mxu0 %v2997_v3  ;;  %v540_v54 = vld [vmem:[%s3098_s15 + $0x40] sm:$0xff]  ;;  %v541_v55 = vld [vmem:[%s3098_s15 + $0x48] sm:$0xff]  ;;  %v2796_v56 = vld [vmem:[%s4060_s2 + $0x1f4] ss:$8 sps:$4 sm:$0xff]  }
  0x1f   : > { %1333 = vmatpush1.bf16.msra.mxu1 %v2763_v24  ;;  %1443 = vmatprep.subr.bf16.mxu0 %v2766_v28  ;;  %v2799_v57 = vld [vmem:[%s4060_s2 + $0xd0] ss:$8 sps:$4 sm:$0xff]   ;;  %v552_v58 = vpack.c.bf16 %v541_v55, %v540_v54  ;;  %v2803_v59 = vld [vmem:[%s4060_s2 + $0xc4] ss:$8 sps:$4 sm:$0xff]   ;;  %v2800_v62 = vld [vmem:[%s4060_s2 + $0x1e0] ss:$8 sps:$4 sm:$0xff]  }
  0x20   : > { %1334 = vmatprep.subr.bf16.mxu1 %v2767_v26  ;;  %v2794_v60 = vld [vmem:[%s4060_s2 + $0x1f0] ss:$8 sps:$4 sm:$0xff]   ;;  %v2802_v61 = vld [vmem:[%s4060_s2 + $0x1e4] ss:$8 sps:$4 sm:$0xff]   ;;  %v2805_v63 = vld [vmem:[%s4060_s2 + $0xc0] ss:$8 sps:$4 sm:$0xff]  }
  0x21   : > { %v542_v0 = vld [vmem:[%s3098_s15 + $0x50] sm:$0xff]  ;;  %v543_v2 = vld [vmem:[%s3098_s15 + $0x58] sm:$0xff]  ;;  %v2815_v7 = vld [vmem:[%s4060_s2 + $0xa4] ss:$8 sps:$4 sm:$0xff]  }
  0x22   : > { %1444 = vmatpush1.bf16.msra.mxu0 %v2764_v29  ;;  %v2809_v1 = vld [vmem:[%s4060_s2 + $0xb4] ss:$8 sps:$4 sm:$0xff]   ;;  %v2811_v5 = vld [vmem:[%s4060_s2 + $0xb0] ss:$8 sps:$4 sm:$0xff]   ;;  %v553_v6 = vpack.c.bf16 %v543_v2, %v542_v0  ;;  %v365_v8 = vld [vmem:[%s3235_s22 + $0x8] sm:$0xff] }
  0x23   : > { %1335 = vmatpush1.bf16.msra.mxu1 %v2769_v30  ;;  %1445 = vmatprep.subr.bf16.mxu0 %v2772_v34  ;;  %v2808_v4 = vld [vmem:[%s4060_s2 + $0x1d4] ss:$8 sps:$4 sm:$0xff]   ;;  %v372_v9 = vld [vmem:[%s3235_s22 + $0x40] sm:$0xff]  ;;  %v2806_v10 = vld [vmem:[%s4060_s2 + $0x1d0] ss:$8 sps:$4 sm:$0xff]  }
  0x24   : > { %1336 = vmatprep.subr.bf16.mxu1 %v2773_v32  ;;  %v477_v11 = vpack.c.bf16 %v372_v9, %v365_v8  ;;  %v2814_v12 = vld [vmem:[%s4060_s2 + $0x1c4] ss:$8 sps:$4 sm:$0xff]   ;;  %v2817_v13 = vld [vmem:[%s4060_s2 + $0xa0] ss:$8 sps:$4 sm:$0xff]   ;;  %v2821_v14 = vld [vmem:[%s4060_s2 + $0x94] ss:$8 sps:$4 sm:$0xff]  }
  0x25   : > { %2519 = vmatmul.mubr.msk.bf16.gmra.mxu0 %vm664_vm1, %v550_v36  ;;  %v2812_v15 = vld [vmem:[%s4060_s2 + $0x1c0] ss:$8 sps:$4 sm:$0xff]   ;;  %v2820_v18 = vld [vmem:[%s4060_s2 + $0x1b4] ss:$8 sps:$4 sm:$0xff]   ;;  %v2823_v19 = vld [vmem:[%s4060_s2 + $0x90] ss:$8 sps:$4 sm:$0xff]  }
  0x26   : > { %1446 = vmatpush1.bf16.msra.mxu0 %v2770_v38  ;;  %758 = vmatprep.mubr.bf16.mxu0 %v2997_v3  ;;  %v544_v16 = vld [vmem:[%s3098_s15 + $0x60] sm:$0xff]  ;;  %v545_v17 = vld [vmem:[%s3098_s15 + $0x68] sm:$0xff]  ;;  %v2818_v22 = vld [vmem:[%s4060_s2 + $0x1b0] ss:$8 sps:$4 sm:$0xff]  }
  0x27   : > { %1337 = vmatpush1.bf16.msra.mxu1 %v2775_v35  ;;  %1447 = vmatprep.subr.bf16.mxu0 %v2778_v39  ;;  %v554_v20 = vpack.c.bf16 %v545_v17, %v544_v16  ;;  %v2827_v21 = vld [vmem:[%s4060_s2 + $0x84] ss:$8 sps:$4 sm:$0xff]   ;;  %v2824_v24 = vld [vmem:[%s4060_s2 + $0x1a0] ss:$8 sps:$4 sm:$0xff]   ;;  %v371_v27 = vld [vmem:[%s3235_s22 + $0x38] sm:$0xff] }
  0x28   : > { %1338 = vmatprep.subr.bf16.mxu1 %v2779_v37  ;;  %1356 = vmatprep.mubr.bf16.mxu1 %v477_v11  ;;  %v2826_v23 = vld [vmem:[%s4060_s2 + $0x1a4] ss:$8 sps:$4 sm:$0xff]   ;;  %v2829_v25 = vld [vmem:[%s4060_s2 + $0x80] ss:$8 sps:$4 sm:$0xff]   ;;  %v2832_v28 = vld [vmem:[%s4060_s2 + $0x194] ss:$8 sps:$4 sm:$0xff]  }
  0x29   : > { %v364_v26 = vld [vmem:[%s3235_s22] sm:$0xff]  ;;  %v2835_v29 = vld [vmem:[%s4060_s2 + $0x274] ss:$8 sps:$4 sm:$0xff]   ;;  %v2833_v37 = vld [vmem:[%s4060_s2 + $0x270] ss:$8 sps:$4 sm:$0xff]  }
  0x2a   : > { %1448 = vmatpush1.bf16.msra.mxu0 %v2776_v42  ;;  %v379_v30 = vld [vmem:[%s3235_s22 + $0x78] sm:$0xff]  ;;  %v386_v31 = vld [vmem:[%s3235_s22 + $0xb0] sm:$0xff]  ;;  %v476_v34 = vpack.c.bf16 %v371_v27, %v364_v26  ;;  %v2838_v42 = vld [vmem:[%s4060_s2 + $0x184] ss:$8 sps:$4 sm:$0xff]  }
  0x2b   : > { %1339 = vmatpush1.bf16.msra.mxu1 %v2781_v40  ;;  %1449 = vmatprep.subr.bf16.mxu0 %v2784_v45  ;;  %v546_v32 = vld [vmem:[%s3098_s15 + $0x70] sm:$0xff]  ;;  %v547_v33 = vld [vmem:[%s3098_s15 + $0x78] sm:$0xff]  ;;  %v484_v38 = vpack.c.bf16 %v386_v31, %v379_v30  ;;  %v2841_v40 = vld [vmem:[%s4060_s2 + $0x264] ss:$8 sps:$4 sm:$0xff]  }
  0x2c   : > { %1340 = vmatprep.subr.bf16.mxu1 %v2785_v41  ;;  %v367_v35 = vld [vmem:[%s3235_s22 + $0x18] sm:$0xff]  ;;  %v374_v36 = vld [vmem:[%s3235_s22 + $0x50] sm:$0xff]  ;;  %v555_v39 = vpack.c.bf16 %v547_v33, %v546_v32  ;;  %v2839_v43 = vld [vmem:[%s4060_s2 + $0x260] ss:$8 sps:$4 sm:$0xff]  }
  0x2d   : > { %2520 = vmatmul.mubr.msk.bf16.gmra.mxu0 %vm664_vm1, %v551_v47  ;;  %v2830_v41 = vld [vmem:[%s4060_s2 + $0x190] ss:$8 sps:$4 sm:$0xff]   ;;  %v479_v44 = vpack.c.bf16 %v374_v36, %v367_v35  ;;  %v2844_v47 = vld [vmem:[%s4060_s2 + $0x254] ss:$8 sps:$4 sm:$0xff]   ;;  %v381_v54 = vld [vmem:[%s3235_s22 + $0x88] sm:$0xff] }
  0x2e   : > { %1450 = vmatpush1.bf16.msra.mxu0 %v2782_v49  ;;  %768 = vmatprep.mubr.bf16.mxu0 %v2997_v3  ;;  %v378_v45 = vld [vmem:[%s3235_s22 + $0x70] sm:$0xff]  ;;  %v400_v49 = vld [vmem:[%s3235_s22 + $0x120] sm:$0xff]  ;;  %v413_v16 = vld [vmem:[%s3235_s22 + $0x188] sm:$0xff] }
  0x2f   : > { %1341 = vmatpush2.bf16.msra.mxu1 %v2787_v46  ;;  %1451 = vmatprep.subr.bf16.mxu0 %v2790_v50  ;;  %v385_v46 = vld [vmem:[%s3235_s22 + $0xa8] sm:$0xff]  ;;  %v388_v55 = vld [vmem:[%s3235_s22 + $0xc0] sm:$0xff]  ;;  %v2850_v0 = vld [vmem:[%s4060_s2 + $0x234] ss:$8 sps:$4 sm:$0xff]  }
  0x30   : > { %1342 = vmatprep.subr.bf16.mxu1 %v2791_v48  ;;  %v393_v48 = vld [vmem:[%s3235_s22 + $0xe8] sm:$0xff]  ;;  %v414_v2 = vld [vmem:[%s3235_s22 + $0x190] sm:$0xff]  ;;  %v420_v31 = vld [vmem:[%s3235_s22 + $0x1c0] sm:$0xff] }
  0x31   : > { %v2836_v50 = vld [vmem:[%s4060_s2 + $0x180] ss:$8 sps:$4 sm:$0xff]   ;;  %v402_v8 = vld [vmem:[%s3235_s22 + $0x130] sm:$0xff]  ;;  %v427_v32 = vld [vmem:[%s3235_s22 + $0x1f8] sm:$0xff] }
  0x32   : > { %1452 = vmatpush1.bf16.msra.mxu0 %v2788_v51  ;;  %v366_v51 = vld [vmem:[%s3235_s22 + $0x10] sm:$0xff]  ;;  %v2857_v30 = vld [vmem:[%s4060_s2 + $0x200] ss:$8 sps:$4 sm:$0xff]  }
  0x33   : > { %1343 = vmatpush2.bf16.msra.mxu1 %v2793_v52  ;;  %1453 = vmatprep.subr.bf16.mxu0 %v2796_v56  ;;  %v373_v52 = vld [vmem:[%s3235_s22 + $0x48] sm:$0xff]  ;;  %v2842_v56 = vld [vmem:[%s4060_s2 + $0x250] ss:$8 sps:$4 sm:$0xff]   ;;  %v2856_v17 = vld [vmem:[%s4060_s2 + $0x214] ss:$8 sps:$4 sm:$0xff]  }
  0x34   : > { %1344 = vmatprep.subr.bf16.mxu1 %v2797_v53  ;;  %v483_v53 = vpack.c.bf16 %v385_v46, %v378_v45  ;;  %v2848_v9 = vld [vmem:[%s4060_s2 + $0x230] ss:$8 sps:$4 sm:$0xff]   ;;  %v2862_v33 = vld [vmem:[%s4060_s2 + $0x2f4] ss:$8 sps:$4 sm:$0xff]   ;;  %v408_v36 = vld [vmem:[%s3235_s22 + $0x160] sm:$0xff] }
  0x35   : > { %2521 = vmatmul.mubr.msk.bf16.gmra.mxu0 %vm664_vm1, %v552_v58  ;;  %v478_v58 = vpack.c.bf16 %v373_v52, %v366_v51  ;;  %v442_v35 = vld [vmem:[%s3235_s22 + $0x270] sm:$0xff]  ;;  %v2863_v46 = vld [vmem:[%s4060_s2 + $0x2e0] ss:$8 sps:$4 sm:$0xff]  }
  0x36   : > { %1454 = vmatpush2.bf16.msra.mxu0 %v2794_v60  ;;  %778 = vmatprep.mubr.bf16.mxu0 %v2997_v3  ;;  %v486_v60 = vpack.c.bf16 %v388_v55, %v381_v54  ;;  %v456_v51 = vld [vmem:[%s3235_s22 + $0x2e0] sm:$0xff]  ;;  %v422_v52 = vld [vmem:[%s3235_s22 + $0x1d0] sm:$0xff]  ;;  %v437_v55 = vld [vmem:[%s3235_s22 + $0x248] sm:$0xff] }
  0x37   : > { %1345 = vmatpush2.bf16.msra.mxu1 %v2799_v57  ;;  %1455 = vmatprep.subr.bf16.mxu0 %v2802_v61  ;;  %v491_v57 = vpack.c.bf16 %v400_v49, %v393_v48  ;;  %v2845_v61 = vld [vmem:[%s4060_s2 + $0x240] ss:$8 sps:$4 sm:$0xff]   ;;  %v2868_v49 = vld [vmem:[%s4060_s2 + $0x2d4] ss:$8 sps:$4 sm:$0xff]  }
  0x38   : > { %1346 = vmatprep.subr.bf16.mxu1 %v2803_v59  ;;  %v2847_v59 = vld [vmem:[%s4060_s2 + $0x244] ss:$8 sps:$4 sm:$0xff]  }
  0x39   : > { %v441_v48 = vld [vmem:[%s3235_s22 + $0x268] sm:$0xff] }
  0x3a   : > { %1456 = vmatpush2.bf16.msra.mxu0 %v2800_v62  ;;  %v392_v62 = vld [vmem:[%s3235_s22 + $0xe0] sm:$0xff] }
  0x3b   : > { %1347 = vmatpush2.bf16.msra.mxu1 %v2805_v63  ;;  %1457 = vmatprep.subr.bf16.mxu0 %v2808_v4  ;;  %v399_v63 = vld [vmem:[%s3235_s22 + $0x118] sm:$0xff]  ;;  %v380_v4 = vld [vmem:[%s3235_s22 + $0x80] sm:$0xff] }
  0x3c   : > { %1348 = vmatprep.subr.bf16.mxu1 %v2809_v1  ;;  %v407_v1 = vld [vmem:[%s3235_s22 + $0x158] sm:$0xff] }
  0x3d   : > { %2522 = vmatmul.mubr.msk.bf16.gmra.mxu0 %vm664_vm1, %v553_v6  ;;  %v490_v6 = vpack.c.bf16 %v399_v63, %v392_v62  ;;  %v2869_v62 = vld [vmem:[%s4060_s2 + $0x2c0] ss:$8 sps:$4 sm:$0xff]  }
  0x3e   : > { %1458 = vmatpush2.bf16.msra.mxu0 %v2806_v10  ;;  %788 = vmatprep.mubr.bf16.mxu0 %v2997_v3  ;;  %v498_v10 = vpack.c.bf16 %v414_v2, %v407_v1  ;;  %v436_v63 = vld [vmem:[%s3235_s22 + $0x240] sm:$0xff]  ;;  %v455_v2 = vld [vmem:[%s3235_s22 + $0x2d8] sm:$0xff] }
  0x3f   : > { %1349 = vmatpush2.bf16.msra.mxu1 %v2811_v5  ;;  %1459 = vmatprep.subr.bf16.mxu0 %v2814_v12  ;;  %v387_v5 = vld [vmem:[%s3235_s22 + $0xb8] sm:$0xff]  ;;  %v2853_v12 = vld [vmem:[%s4060_s2 + $0x224] ss:$8 sps:$4 sm:$0xff]  }
  0x40   : > { %1350 = vmatprep.subr.bf16.mxu1 %v2815_v7  ;;  %v395_v7 = vld [vmem:[%s3235_s22 + $0xf8] sm:$0xff]  ;;  %v485_v11 = vpack.c.bf16 %v387_v5, %v380_v4  ;;  %v448_v1 = vld [vmem:[%s3235_s22 + $0x2a0] sm:$0xff] }
  0x41   : > { %v2874_v4 = vld [vmem:[%s4060_s2 + $0x2b4] ss:$8 sps:$4 sm:$0xff]  }
  0x42   : > { %1460 = vmatpush2.bf16.msra.mxu0 %v2812_v15  ;;  %v406_v15 = vld [vmem:[%s3235_s22 + $0x150] sm:$0xff]  ;;  %v463_v5 = vld [vmem:[%s3235_s22 + $0x318] sm:$0xff] }
  0x43   : > { %1351 = vmatpush2.bf16.msra.mxu1 %v2817_v13  ;;  %1461 = vmatprep.subr.bf16.mxu0 %v2820_v18  ;;  %v2851_v13 = vld [vmem:[%s4060_s2 + $0x220] ss:$8 sps:$4 sm:$0xff]  }
  0x44   : > { %1352 = vmatprep.subr.bf16.mxu1 %v2821_v14  ;;  %v493_v14 = vpack.c.bf16 %v402_v8, %v395_v7  ;;  %v421_v18 = vld [vmem:[%s3235_s22 + $0x1c8] sm:$0xff]  ;;  %v2872_v7 = vld [vmem:[%s4060_s2 + $0x2b0] ss:$8 sps:$4 sm:$0xff]  }
  0x45   : > { %2523 = vmatmul.mubr.msk.bf16.gmra.mxu0 %vm664_vm1, %v554_v20  ;;  %v394_v20 = vld [vmem:[%s3235_s22 + $0xf0] sm:$0xff]  ;;  %v451_v8 = vld [vmem:[%s3235_s22 + $0x2b8] sm:$0xff] }
  0x46   : > { %1462 = vmatpush2.bf16.msra.mxu0 %v2818_v22  ;;  %798 = vmatprep.mubr.bf16.mxu0 %v2997_v3  ;;  %v497_v22 = vpack.c.bf16 %v413_v16, %v406_v15  ;;  %v462_v16 = vld [vmem:[%s3235_s22 + $0x310] sm:$0xff] }
  0x47   : > { %1353 = vmatpush2.bf16.msra.mxu1 %v2823_v19  ;;  %1463 = vmatprep.subr.bf16.mxu0 %v2826_v23  ;;  %v428_v19 = vld [vmem:[%s3235_s22 + $0x200] sm:$0xff]  ;;  %v409_v23 = vld [vmem:[%s3235_s22 + $0x168] sm:$0xff] }
  0x48   : > { %1354 = vmatprep.subr.bf16.mxu1 %v2827_v21  ;;  %v401_v21 = vld [vmem:[%s3235_s22 + $0x128] sm:$0xff]  ;;  %v505_v26 = vpack.c.bf16 %v428_v19, %v421_v18  ;;  %v2880_v18 = vld [vmem:[%s4060_s2 + $0x294] ss:$8 sps:$4 sm:$0xff]  }
  0x49   : > { %v492_v27 = vpack.c.bf16 %v401_v21, %v394_v20  ;;  %v383_v19 = vld [vmem:[%s3235_s22 + $0x98] sm:$0xff]  ;;  %v390_v20 = vld [vmem:[%s3235_s22 + $0xd0] sm:$0xff] }
  0x4a   : > { %1464 = vmatpush2.bf16.msra.mxu0 %v2824_v24  ;;  %v416_v24 = vld [vmem:[%s3235_s22 + $0x1a0] sm:$0xff]  ;;  %v450_v21 = vld [vmem:[%s3235_s22 + $0x2b0] sm:$0xff] }
  0x4b   : > { %1355 = vmatpush2.bf16.msra.mxu1 %v2829_v25  ;;  %1465 = vmatprep.subr.bf16.mxu0 %v2832_v28  ;;  %v2854_v25 = vld [vmem:[%s4060_s2 + $0x210] ss:$8 sps:$4 sm:$0xff]   ;;  %v2859_v28 = vld [vmem:[%s4060_s2 + $0x204] ss:$8 sps:$4 sm:$0xff]  }
  0x4c   : > { %2669 = vmatprep.subr.bf16.mxu1 %v2835_v29 }
  0x4d   : > { %2524 = vmatmul.mubr.msk.bf16.gmra.mxu0 %vm664_vm1, %v555_v39  ;;  %v504_v39 = vpack.c.bf16 %v427_v32, %v420_v31  ;;  %v2881_v31 = vld [vmem:[%s4060_s2 + $0x280] ss:$8 sps:$4 sm:$0xff]   ;;  %v382_v32 = vld [vmem:[%s3235_s22 + $0x90] sm:$0xff] }
  0x4e   : > { %1357 = vmatmul.mubr.bf16.vlgmr.msra.gmra.mxu1 %v476_v34  ;;  %1466 = vmatpush2.bf16.msra.mxu0 %v2830_v41  ;;  %v435_v34 = vld [vmem:[%s3235_s22 + $0x238] sm:$0xff] }
  0x4f   : > { %2685 = vmatpush1.bf16.msra.mxu1 %v2833_v37  ;;  %1366 = vmatprep.mubr.bf16.mxu1 %v484_v38  ;;  %v423_v38 = vld [vmem:[%s3235_s22 + $0x1d8] sm:$0xff] }
  0x50   : > { %2670 = vmatprep.subr.bf16.mxu1 %v2841_v40  ;;  %1469 = vmatprep.mubr.bf16.mxu0 %v479_v44  ;;  %v2860_v41 = vld [vmem:[%s4060_s2 + $0x2f0] ss:$8 sps:$4 sm:$0xff]   ;;  %v2865_v44 = vld [vmem:[%s4060_s2 + $0x2e4] ss:$8 sps:$4 sm:$0xff]  }
  0x51   : > { %1467 = vmatprep.subr.bf16.mxu0 %v2838_v42  ;;  %v512_v42 = vpack.c.bf16 %v442_v35, %v435_v34  ;;  %v397_v34 = vld [vmem:[%s3235_s22 + $0x108] sm:$0xff]  ;;  %v404_v35 = vld [vmem:[%s3235_s22 + $0x140] sm:$0xff] }
  0x52   : > { %1468 = vmatpush2.bf16.msra.mxu0 %v2836_v50  ;;  %v449_v50 = vld [vmem:[%s3235_s22 + $0x2a8] sm:$0xff] }
  0x53   : > { %2686 = vmatpush1.bf16.msra.mxu1 %v2839_v43  ;;  %1550 = vmatprep.subr.bf16.mxu0 %v2835_v29  ;;  %v500_v29 = vpack.c.bf16 %v416_v24, %v409_v23  ;;  %v465_v24 = vld [vmem:[%s3235_s22 + $0x328] sm:$0xff] }
  0x54   : > { %2671 = vmatprep.subr.bf16.mxu1 %v2844_v47 }
  0x55   : > { %1470 = vmatmul.mubr.bf16.vlgmr.msra.gmra.mxu0 %v478_v58  ;;  %v519_v58 = vpack.c.bf16 %v456_v51, %v449_v50  ;;  %v2886_v50 = vld [vmem:[%s4060_s2 + $0x304] ss:$8 sps:$4 sm:$0xff]  }
  0x56   : > { %1367 = vmatmul.mubr.bf16.gmra.mxu1 %v483_v53  ;;  %1551 = vmatpush1.bf16.msra.mxu0 %v2833_v37  ;;  %v415_v37 = vld [vmem:[%s3235_s22 + $0x198] sm:$0xff]  ;;  %v429_v53 = vld [vmem:[%s3235_s22 + $0x208] sm:$0xff] }
  0x57   : > { %2687 = vmatpush1.bf16.msra.mxu1 %v2842_v56  ;;  %1376 = vmatprep.mubr.bf16.mxu1 %v491_v57  ;;  %v2866_v57 = vld [vmem:[%s4060_s2 + $0x2d0] ss:$8 sps:$4 sm:$0xff]  }
  0x58   : > { %2672 = vmatprep.subr.bf16.mxu1 %v2847_v59  ;;  %1479 = vmatprep.mubr.bf16.mxu0 %v486_v60  ;;  %v2871_v60 = vld [vmem:[%s4060_s2 + $0x2c4] ss:$8 sps:$4 sm:$0xff]  }
  0x59   : > { %1552 = vmatprep.subr.bf16.mxu0 %v2841_v40  ;;  %v430_v40 = vld [vmem:[%s3235_s22 + $0x210] sm:$0xff] }
  0x5a   : > { %1553 = vmatpush1.bf16.msra.mxu0 %v2839_v43  ;;  %v499_v43 = vpack.c.bf16 %v415_v37, %v408_v36  ;;  %v507_v45 = vpack.c.bf16 %v430_v40, %v423_v38  ;;  %v464_v36 = vld [vmem:[%s3235_s22 + $0x320] sm:$0xff]  ;;  %v471_v37 = vld [vmem:[%s3235_s22 + $0x358] sm:$0xff] }
  0x5b   : > { %2688 = vmatpush1.bf16.msra.mxu1 %v2845_v61  ;;  %1554 = vmatprep.subr.bf16.mxu0 %v2844_v47  ;;  %v434_v47 = vld [vmem:[%s3235_s22 + $0x230] sm:$0xff]  ;;  %v376_v40 = vld [vmem:[%s3235_s22 + $0x60] sm:$0xff] }
  0x5c   : > { %2673 = vmatprep.subr.bf16.mxu1 %v2850_v0  ;;  %v511_v54 = vpack.c.bf16 %v441_v48, %v434_v47  ;;  %v418_v47 = vld [vmem:[%s3235_s22 + $0x1b0] sm:$0xff]  ;;  %v368_v48 = vld [vmem:[%s3235_s22 + $0x20] sm:$0xff] }
  0x5d   : > { %1480 = vmatmul.mubr.bf16.gmra.mxu0 %v485_v11  ;;  %v2877_v11 = vld [vmem:[%s4060_s2 + $0x2a4] ss:$8 sps:$4 sm:$0xff]  }
  0x5e   : > { %1377 = vmatmul.mubr.bf16.gmra.mxu1 %v490_v6  ;;  %1555 = vmatpush1.bf16.msra.mxu0 %v2842_v56  ;;  %v444_v56 = vld [vmem:[%s3235_s22 + $0x280] sm:$0xff]  ;;  %v470_v6 = vld [vmem:[%s3235_s22 + $0x350] sm:$0xff] }
  0x5f   : > { %2689 = vmatpush1.bf16.msra.mxu1 %v2848_v9  ;;  %1386 = vmatprep.mubr.bf16.mxu1 %v498_v10  ;;  %v518_v10 = vpack.c.bf16 %v455_v2, %v448_v1  ;;  %v431_v1 = vld [vmem:[%s3235_s22 + $0x218] sm:$0xff] }
  0x60   : > { %2674 = vmatprep.subr.bf16.mxu1 %v2853_v12  ;;  %1489 = vmatprep.mubr.bf16.mxu0 %v493_v14  ;;  %v2875_v14 = vld [vmem:[%s4060_s2 + $0x2a0] ss:$8 sps:$4 sm:$0xff]   ;;  %v439_v2 = vld [vmem:[%s3235_s22 + $0x258] sm:$0xff] }
  0x61   : > { %1556 = vmatprep.subr.bf16.mxu0 %v2847_v59  ;;  %v506_v59 = vpack.c.bf16 %v429_v53, %v422_v52 }
  0x62   : > { %1557 = vmatpush1.bf16.msra.mxu0 %v2845_v61  ;;  %v514_v61 = vpack.c.bf16 %v444_v56, %v437_v55  ;;  %v410_v55 = vld [vmem:[%s3235_s22 + $0x170] sm:$0xff]  ;;  %v417_v56 = vld [vmem:[%s3235_s22 + $0x1a8] sm:$0xff] }
  0x63   : > { %2690 = vmatpush1.bf16.msra.mxu1 %v2851_v13  ;;  %1558 = vmatprep.subr.bf16.mxu0 %v2850_v0  ;;  %v443_v0 = vld [vmem:[%s3235_s22 + $0x278] sm:$0xff] }
  0x64   : > { %2675 = vmatprep.subr.bf16.mxu1 %v2856_v17 }
  0x65   : > { %1490 = vmatmul.mubr.bf16.gmra.mxu0 %v492_v27  ;;  %v488_v27 = vpack.c.bf16 %v390_v20, %v383_v19  ;;  %v452_v19 = vld [vmem:[%s3235_s22 + $0x2c0] sm:$0xff]  ;;  %v459_v20 = vld [vmem:[%s3235_s22 + $0x2f8] sm:$0xff] }
  0x66   : > { %1387 = vmatmul.mubr.bf16.gmra.mxu1 %v497_v22  ;;  %1559 = vmatpush1.bf16.msra.mxu0 %v2848_v9  ;;  %v458_v9 = vld [vmem:[%s3235_s22 + $0x2f0] sm:$0xff]  ;;  %v457_v22 = vld [vmem:[%s3235_s22 + $0x2e8] sm:$0xff] }
  0x67   : > { %2691 = vmatpush1.bf16.msra.mxu1 %v2854_v25  ;;  %1396 = vmatprep.mubr.bf16.mxu1 %v505_v26  ;;  %v521_v15 = vpack.c.bf16 %v458_v9, %v451_v8  ;;  %v2878_v26 = vld [vmem:[%s4060_s2 + $0x290] ss:$8 sps:$4 sm:$0xff]  }
  0x68   : > { %2676 = vmatprep.subr.bf16.mxu1 %v2859_v28  ;;  %1499 = vmatprep.mubr.bf16.mxu0 %v500_v29  ;;  %v2883_v29 = vld [vmem:[%s4060_s2 + $0x284] ss:$8 sps:$4 sm:$0xff]  }
  0x69   : > { %1560 = vmatprep.subr.bf16.mxu0 %v2853_v12  ;;  %v526_v12 = vpack.c.bf16 %v470_v6, %v463_v5  ;;  %v384_v5 = vld [vmem:[%s3235_s22 + $0xa0] sm:$0xff]  ;;  %v391_v6 = vld [vmem:[%s3235_s22 + $0xd8] sm:$0xff] }
  0x6a   : > { %1561 = vmatpush1.bf16.msra.mxu0 %v2851_v13  ;;  %v513_v13 = vpack.c.bf16 %v443_v0, %v436_v63  ;;  %v424_v0 = vld [vmem:[%s3235_s22 + $0x1e0] sm:$0xff]  ;;  %v489_v9 = vpack.c.bf16 %v391_v6, %v384_v5 }
  0x6b   : > { %2692 = vmatpush1.bf16.msra.mxu1 %v2857_v30  ;;  %1562 = vmatprep.subr.bf16.mxu0 %v2856_v17  ;;  %v469_v17 = vld [vmem:[%s3235_s22 + $0x348] sm:$0xff] }
  0x6c   : > { %2677 = vmatprep.subr.bf16.mxu1 %v2862_v33  ;;  %v525_v23 = vpack.c.bf16 %v469_v17, %v462_v16 }
  0x6d   : > { %1500 = vmatmul.mubr.bf16.gmra.mxu0 %v499_v43 }
  0x6e   : > { %1397 = vmatmul.mubr.bf16.gmra.mxu1 %v504_v39  ;;  %1563 = vmatpush1.bf16.msra.mxu0 %v2854_v25  ;;  %v472_v25 = vld [vmem:[%s3235_s22 + $0x360] sm:$0xff]  ;;  %v369_v39 = vld [vmem:[%s3235_s22 + $0x28] sm:$0xff] }
  0x6f   : > { %2693 = vmatpush2.bf16.msra.mxu1 %v2860_v41  ;;  %1406 = vmatprep.mubr.bf16.mxu1 %v512_v42  ;;  %v527_v42 = vpack.c.bf16 %v471_v37, %v464_v36  ;;  %v481_v43 = vpack.c.bf16 %v376_v40, %v369_v39  ;;  %v2892_v36 = vld [vmem:[%s4063_s5 + $0x64] ss:$8 sps:$4 sm:$0xff]   ;;  %v2890_v37 = vld [vmem:[%s4063_s5 + $0x60] ss:$8 sps:$4 sm:$0xff]   ;;  %v447_v39 = vld [vmem:[%s3235_s22 + $0x298] sm:$0xff] }
  0x70   : > { %2678 = vmatprep.subr.bf16.mxu1 %v2865_v44  ;;  %1509 = vmatprep.mubr.bf16.mxu0 %v507_v45  ;;  %v403_v45 = vld [vmem:[%s3235_s22 + $0x138] sm:$0xff] }
  0x71   : > { %1564 = vmatprep.subr.bf16.mxu0 %v2859_v28  ;;  %v520_v28 = vpack.c.bf16 %v457_v22, %v450_v21  ;;  %v467_v21 = vld [vmem:[%s3235_s22 + $0x338] sm:$0xff]  ;;  %v474_v22 = vld [vmem:[%s3235_s22 + $0x370] sm:$0xff] }
  0x72   : > { %1565 = vmatpush1.bf16.msra.mxu0 %v2857_v30  ;;  %v528_v30 = vpack.c.bf16 %v472_v25, %v465_v24  ;;  %v419_v24 = vld [vmem:[%s3235_s22 + $0x1b8] sm:$0xff]  ;;  %v522_v25 = vpack.c.bf16 %v459_v20, %v452_v19 }
  0x73   : > { %2694 = vmatpush2.bf16.msra.mxu1 %v2863_v46  ;;  %1566 = vmatprep.subr.bf16.mxu0 %v2862_v33  ;;  %v389_v33 = vld [vmem:[%s3235_s22 + $0xc8] sm:$0xff]  ;;  %v2895_v40 = vld [vmem:[%s4063_s5 + $0x54] ss:$8 sps:$4 sm:$0xff]  }
  0x74   : > { %2679 = vmatprep.subr.bf16.mxu1 %v2868_v49  ;;  %v487_v38 = vpack.c.bf16 %v389_v33, %v382_v32  ;;  %v2889_v33 = vld [vmem:[%s4063_s5 + $0x74] ss:$8 sps:$4 sm:$0xff]  }
  0x75   : > { %1510 = vmatmul.mubr.bf16.gmra.mxu0 %v506_v59  ;;  %v370_v59 = vld [vmem:[%s3235_s22 + $0x30] sm:$0xff] }
  0x76   : > { %1407 = vmatmul.mubr.bf16.gmra.mxu1 %v511_v54  ;;  %1567 = vmatpush2.bf16.msra.mxu0 %v2860_v41  ;;  %v495_v41 = vpack.c.bf16 %v404_v35, %v397_v34  ;;  %v2884_v54 = vld [vmem:[%s4060_s2 + $0x300] ss:$8 sps:$4 sm:$0xff]   ;;  %v2887_v34 = vld [vmem:[%s4063_s5 + $0x70] ss:$8 sps:$4 sm:$0xff]  }
  0x77   : > { %2695 = vmatpush2.bf16.msra.mxu1 %v2866_v57  ;;  %1416 = vmatprep.mubr.bf16.mxu1 %v519_v58  ;;  %v432_v58 = vld [vmem:[%s3235_s22 + $0x220] sm:$0xff] }
  0x78   : > { %2680 = vmatprep.subr.bf16.mxu1 %v2871_v60  ;;  %1519 = vmatprep.mubr.bf16.mxu0 %v514_v61  ;;  %v501_v61 = vpack.c.bf16 %v417_v56, %v410_v55  ;;  %v2905_v55 = vld [vmem:[%s4063_s5 + $0x10] ss:$8 sps:$4 sm:$0xff]  }
  0x79   : > { %1568 = vmatprep.subr.bf16.mxu0 %v2865_v44  ;;  %v396_v44 = vld [vmem:[%s3235_s22 + $0x100] sm:$0xff] }
  0x7a   : > { %1569 = vmatpush2.bf16.msra.mxu0 %v2863_v46  ;;  %v411_v46 = vld [vmem:[%s3235_s22 + $0x178] sm:$0xff]  ;;  %v494_v51 = vpack.c.bf16 %v403_v45, %v396_v44  ;;  %v2896_v44 = vld [vmem:[%s4063_s5 + $0x40] ss:$8 sps:$4 sm:$0xff]   ;;  %v454_v45 = vld [vmem:[%s3235_s22 + $0x2d0] sm:$0xff] }
  0x7b   : > { %2696 = vmatpush2.bf16.msra.mxu1 %v2869_v62  ;;  %1570 = vmatprep.subr.bf16.mxu0 %v2868_v49  ;;  %v375_v49 = vld [vmem:[%s3235_s22 + $0x58] sm:$0xff]  ;;  %v502_v52 = vpack.c.bf16 %v418_v47, %v411_v46  ;;  %v461_v46 = vld [vmem:[%s3235_s22 + $0x308] sm:$0xff] }
  0x7c   : > { %2681 = vmatprep.subr.bf16.mxu1 %v2874_v4  ;;  %v480_v53 = vpack.c.bf16 %v375_v49, %v368_v48  ;;  %v2901_v47 = vld [vmem:[%s4063_s5 + $0x34] ss:$8 sps:$4 sm:$0xff]   ;;  %v2899_v48 = vld [vmem:[%s4063_s5 + $0x30] ss:$8 sps:$4 sm:$0xff]   ;;  %v524_v49 = vpack.c.bf16 %v461_v46, %v454_v45 }
  0x7d   : > { %1520 = vmatmul.mubr.bf16.gmra.mxu0 %v513_v13  ;;  %v460_v13 = vld [vmem:[%s3235_s22 + $0x300] sm:$0xff] }
  0x7e   : > { %1417 = vmatmul.mubr.bf16.gmra.mxu1 %v518_v10  ;;  %1571 = vmatpush2.bf16.msra.mxu0 %v2866_v57  ;;  %v425_v57 = vld [vmem:[%s3235_s22 + $0x1e8] sm:$0xff]  ;;  %v438_v10 = vld [vmem:[%s3235_s22 + $0x250] sm:$0xff] }
  0x7f   : > { %2697 = vmatpush2.bf16.msra.mxu1 %v2872_v7  ;;  %1426 = vmatprep.mubr.bf16.mxu1 %v526_v12  ;;  %v453_v12 = vld [vmem:[%s3235_s22 + $0x2c8] sm:$0xff] }
  0x80   : > { %2682 = vmatprep.subr.bf16.mxu1 %v2877_v11  ;;  %1529 = vmatprep.mubr.bf16.mxu0 %v521_v15  ;;  %v405_v15 = vld [vmem:[%s3235_s22 + $0x148] sm:$0xff]  ;;  %v523_v17 = vpack.c.bf16 %v460_v13, %v453_v12  ;;  %v2919_v12 = vld [vmem:[%s4063_s5 + $0x90] ss:$8 sps:$4 sm:$0xff]  }
  0x81   : > { %1572 = vmatprep.subr.bf16.mxu0 %v2871_v60  ;;  %v377_v60 = vld [vmem:[%s3235_s22 + $0x68] sm:$0xff] }
  0x82   : > { %1573 = vmatpush2.bf16.msra.mxu0 %v2869_v62  ;;  %v509_v62 = vpack.c.bf16 %v432_v58, %v425_v57  ;;  %v482_v63 = vpack.c.bf16 %v377_v60, %v370_v59  ;;  %v2908_v57 = vld [vmem:[%s4063_s5] ss:$8 sps:$4 sm:$0xff]  }
  0x83   : > { %2698 = vmatpush2.bf16.msra.mxu1 %v2875_v14  ;;  %1574 = vmatprep.subr.bf16.mxu0 %v2874_v4  ;;  %v446_v4 = vld [vmem:[%s3235_s22 + $0x290] sm:$0xff]  ;;  %v1892_v59 = vld [vmem:[%s4063_s5 + $0xc0] sm:$0xff] }
  0x84   : > { %2683 = vmatprep.subr.bf16.mxu1 %v2880_v18  ;;  %v516_v8 = vpack.c.bf16 %v446_v4, %v439_v2  ;;  %v2915_v2 = vld [vmem:[%s4063_s5 + $0xb4] ss:$8 sps:$4 sm:$0xff]   ;;  %v2913_v4 = vld [vmem:[%s4063_s5 + $0xb0] ss:$8 sps:$4 sm:$0xff]  }
  0x85   : > { %1530 = vmatmul.mubr.bf16.gmra.mxu0 %v520_v28  ;;  %v466_v28 = vld [vmem:[%s3235_s22 + $0x330] sm:$0xff] }
  0x86   : > { %1427 = vmatmul.mubr.bf16.gmra.mxu1 %v525_v23  ;;  %1575 = vmatpush2.bf16.msra.mxu0 %v2872_v7  ;;  %v508_v7 = vpack.c.bf16 %v431_v1, %v424_v0  ;;  %v412_v23 = vld [vmem:[%s3235_s22 + $0x180] sm:$0xff] }
  0x87   : > { %2699 = vmatpush2.bf16.msra.mxu1 %v2878_v26  ;;  %1592 = vmatprep.mubr.bf16.mxu1 %v488_v27  ;;  %v503_v27 = vpack.c.bf16 %v419_v24, %v412_v23 }
  0x88   : > { %2684 = vmatprep.subr.bf16.mxu1 %v2883_v29  ;;  %1539 = vmatprep.mubr.bf16.mxu0 %v528_v30  ;;  %v426_v30 = vld [vmem:[%s3235_s22 + $0x1f0] sm:$0xff] }
  0x89   : > { %1576 = vmatprep.subr.bf16.mxu0 %v2877_v11  ;;  %v445_v11 = vld [vmem:[%s3235_s22 + $0x288] sm:$0xff] }
  0x8a   : > { %1577 = vmatpush2.bf16.msra.mxu0 %v2875_v14  ;;  %v398_v14 = vld [vmem:[%s3235_s22 + $0x110] sm:$0xff]  ;;  %v515_v16 = vpack.c.bf16 %v445_v11, %v438_v10 }
  0x8b   : > { %2700 = vmatpush2.bf16.msra.mxu1 %v2881_v31  ;;  %1578 = vmatprep.subr.bf16.mxu0 %v2880_v18  ;;  %v496_v18 = vpack.c.bf16 %v405_v15, %v398_v14  ;;  %v2921_v11 = vld [vmem:[%s4063_s5 + $0x94] ss:$8 sps:$4 sm:$0xff]   ;;  %v2924_v15 = vld [vmem:[%s4063_s5 + $0x84] ss:$8 sps:$4 sm:$0xff]  }
  0x8c   : > { %2701 = vmatprep.subr.bf16.mxu1 %v2889_v33 }
  0x8d   : > { %1540 = vmatmul.mubr.bf16.gmra.mxu0 %v527_v42 }
  0x8e   : > { %1593 = vmatmul.mubr.bf16.vlgmr.msra.gmra.mxu1 %v487_v38  ;;  %1579 = vmatpush2.bf16.msra.mxu0 %v2878_v26  ;;  %v530_v26 = vpack.c.bf16 %v474_v22, %v467_v21  ;;  %v440_v38 = vld [vmem:[%s3235_s22 + $0x260] sm:$0xff] }
  0x8f   : > { %1602 = vmatprep.mubr.bf16.mxu1 %v495_v41  ;;  %1582 = vmatprep.mubr.bf16.mxu0 %v481_v43  ;;  %v2893_v41 = vld [vmem:[%s4063_s5 + $0x50] ss:$8 sps:$4 sm:$0xff]   ;;  %v517_v42 = vpack.c.bf16 %v447_v39, %v440_v38  ;;  %v2898_v43 = vld [vmem:[%s4063_s5 + $0x44] ss:$8 sps:$4 sm:$0xff]  }
  0x90   : > { %1580 = vmatprep.subr.bf16.mxu0 %v2883_v29  ;;  %v473_v29 = vld [vmem:[%s3235_s22 + $0x368] sm:$0xff]  ;;  %2714 = vmatpush1.bf16.msra.mxu1 %v2887_v34 }
  0x91   : > { %v529_v32 = vpack.c.bf16 %v473_v29, %v466_v28  ;;  %2702 = vmatprep.subr.bf16.mxu1 %v2892_v36 }
  0x92   : > { %1581 = vmatpush2.bf16.msra.mxu0 %v2881_v31  ;;  %v433_v31 = vld [vmem:[%s3235_s22 + $0x228] sm:$0xff] }
  0x93   : > { %1677 = vmatprep.subr.bf16.mxu0 %v2886_v50  ;;  %v510_v35 = vpack.c.bf16 %v433_v31, %v426_v30  ;;  %v2904_v50 = vld [vmem:[%s4063_s5 + $0x24] ss:$8 sps:$4 sm:$0xff]  }
  0x94   : > { %2715 = vmatpush1.bf16.msra.mxu1 %v2890_v37 }
  0x95   : > { %1583 = vmatmul.mubr.bf16.vlgmr.msra.gmra.mxu0 %v480_v53  ;;  %2703 = vmatprep.subr.bf16.mxu1 %v2895_v40  ;;  %v475_v53 = vld [vmem:[%s3235_s22 + $0x378] sm:$0xff] }
  0x96   : > { %1603 = vmatmul.mubr.bf16.gmra.mxu1 %v494_v51  ;;  %1678 = vmatpush1.bf16.msra.mxu0 %v2884_v54  ;;  %v2902_v51 = vld [vmem:[%s4063_s5 + $0x20] ss:$8 sps:$4 sm:$0xff]   ;;  %v2907_v54 = vld [vmem:[%s4063_s5 + $0x14] ss:$8 sps:$4 sm:$0xff]  }
  0x97   : > { %1612 = vmatprep.mubr.bf16.mxu1 %v502_v52  ;;  %1695 = vmatprep.mubr.bf16.mxu0 %v2997_v3  ;;  %v468_v52 = vld [vmem:[%s3235_s22 + $0x340] sm:$0xff] }
  0x98   : > { %2062 = vmatprep.subr.bf16.mxu0 %v2889_v33  ;;  %2716 = vmatpush1.bf16.msra.mxu1 %v2893_v41  ;;  %v531_v56 = vpack.c.bf16 %v475_v53, %v468_v52 }
  0x99   : > { %2704 = vmatprep.subr.bf16.mxu1 %v2898_v43 }
  0x9c   : > { %2717 = vmatpush1.bf16.msra.mxu1 %v2896_v44 }
  0x9d   : > { %2623 = vmatmul.mubr.msk.bf16.vlgmr.msra.gmra.mxu0 %vm1299_vm2, %v482_v63  ;;  %2705 = vmatprep.subr.bf16.mxu1 %v2901_v47 }
  0x9e   : > { %1613 = vmatmul.mubr.bf16.gmra.mxu1 %v501_v61  ;;  %1705 = vmatprep.mubr.bf16.mxu0 %v2997_v3  ;;  %v2656_v61 = vcombine.high %v1892_v59, %v1892_v59 }
  0x9f   : > { %1622 = vmatprep.mubr.bf16.mxu1 %v509_v62  ;;  %2063 = vmatpush1.bf16.msra.mxu0 %v2887_v34  ;;  %v2655_v62 = vcombine.low %v1892_v59, %v1892_v59 }
  0xa0   : > { %2064 = vmatprep.subr.bf16.mxu0 %v2892_v36  ;;  %2718 = vmatpush1.bf16.msra.mxu1 %v2899_v48 }
  0xa1   : > { %2706 = vmatprep.subr.bf16.mxu1 %v2904_v50  ;;  %v2057_v0 = vsel %vm2055_vm3, %v2655_v62, 0 }
  0xa3   : > { %2065 = vmatpush1.bf16.msra.mxu0 %v2890_v37 }
  0xa4   : > { %2066 = vmatprep.subr.bf16.mxu0 %v2895_v40  ;;  %2719 = vmatpush1.bf16.msra.mxu1 %v2902_v51 }
  0xa5   : > { %2624 = vmatmul.mubr.msk.bf16.gmra.mxu0 %vm1299_vm2, %v489_v9  ;;  %2707 = vmatprep.subr.bf16.mxu1 %v2907_v54 }
  0xa6   : > { %1623 = vmatmul.mubr.bf16.gmra.mxu1 %v508_v7  ;;  %1715 = vmatprep.mubr.bf16.mxu0 %v2997_v3  ;;  %v2918_v7 = vld [vmem:[%s4063_s5 + $0xa4] ss:$8 sps:$4 sm:$0xff]  }
  0xa7   : > { %1632 = vmatprep.mubr.bf16.mxu1 %v516_v8  ;;  %2067 = vmatpush1.bf16.msra.mxu0 %v2893_v41  ;;  %v2916_v8 = vld [vmem:[%s4063_s5 + $0xa0] ss:$8 sps:$4 sm:$0xff]  }
  0xa8   : > { %2068 = vmatprep.subr.bf16.mxu0 %v2898_v43  ;;  %2720 = vmatpush1.bf16.msra.mxu1 %v2905_v55 }
  0xab   : > { %2069 = vmatpush1.bf16.msra.mxu0 %v2896_v44 }
  0xac   : > { %2070 = vmatprep.subr.bf16.mxu0 %v2901_v47 }
  0xad   : > { %2625 = vmatmul.mubr.msk.bf16.gmra.mxu0 %vm1299_vm2, %v496_v18 }
  0xae   : > { %1633 = vmatmul.mubr.bf16.gmra.mxu1 %v515_v16  ;;  %1725 = vmatprep.mubr.bf16.mxu0 %v2997_v3  ;;  %v2922_v16 = vld [vmem:[%s4063_s5 + $0x80] ss:$8 sps:$4 sm:$0xff]  }
  0xaf   : > { %1642 = vmatprep.mubr.bf16.mxu1 %v523_v17  ;;  %2071 = vmatpush1.bf16.msra.mxu0 %v2899_v48 }
  0xb0   : > { %2072 = vmatprep.subr.bf16.mxu0 %v2904_v50 }
  0xb3   : > { %2073 = vmatpush1.bf16.msra.mxu0 %v2902_v51 }
  0xb4   : > { %2074 = vmatprep.subr.bf16.mxu0 %v2907_v54 }
  0xb5   : > { %2626 = vmatmul.mubr.msk.bf16.gmra.mxu0 %vm1299_vm2, %v503_v27 }
  0xb6   : > { %1643 = vmatmul.mubr.bf16.gmra.mxu1 %v522_v25  ;;  %1735 = vmatprep.mubr.bf16.mxu0 %v2997_v3 }
  0xb7   : > { %1652 = vmatprep.mubr.bf16.mxu1 %v530_v26  ;;  %2075 = vmatpush1.bf16.msra.mxu0 %v2905_v55 }
  0xbd   : > { %2627 = vmatmul.mubr.msk.bf16.gmra.mxu0 %vm1299_vm2, %v510_v35 }
  0xbe   : > { %1653 = vmatmul.mubr.bf16.gmra.mxu1 %v529_v32  ;;  %1745 = vmatprep.mubr.bf16.mxu0 %v2997_v3 }
  0xc5   : > { %2628 = vmatmul.mubr.msk.bf16.gmra.mxu0 %vm1299_vm2, %v517_v42 }
  0xc6   : > { %1755 = vmatprep.mubr.bf16.mxu0 %v2997_v3 }
  0xcd   : > { %2629 = vmatmul.mubr.msk.bf16.gmra.mxu0 %vm1299_vm2, %v524_v49 }
  0xce   : > { %1765 = vmatprep.mubr.bf16.mxu0 %v2997_v3  ;;  %v2910_v3 = vld [vmem:[%s4063_s5 + $0x4] ss:$8 sps:$4 sm:$0xff]  }
  0xcf   : > { %2076 = vmatprep.subr.bf16.mxu0 %v2910_v3  ;;  %2708 = vmatprep.subr.bf16.mxu1 %v2910_v3 }
  0xd0   : > { %2077 = vmatpush1.bf16.msra.mxu0 %v2908_v57  ;;  %2721 = vmatpush1.bf16.msra.mxu1 %v2908_v57 }
  0xd1   : > { %2657 = vmatprep.subr.msk.bf16.mxu0 %vm2055_vm3, %v2656_v61  ;;  %2709 = vmatprep.subr.msk.bf16.mxu1 %vm2055_vm3, %v2656_v61 }
  0xd4   : > { %2085 = vmatpush2.bf16.msra.mxu0 %v2057_v0  ;;  %2722 = vmatpush2.bf16.msra.mxu1 %v2057_v0 }
  0xd5   : > { %v3582_v58 = vpop.f32.mrf.mxu0  ;;  %2630 = vmatmul.mubr.msk.bf16.gmra.mxu0 %vm1299_vm2, %v531_v56  ;;  %2086 = vmatprep.subr.bf16.mxu0 %v2915_v2 }
  0xd6   : > { %2710 = vmatprep.subr.bf16.mxu1 %v2915_v2 }
  0xd7   : > { %v3588_v60 = vpop.f32.mrf.mxu0 }
  0xd8   : > { %2087 = vmatpush2.bf16.msra.mxu0 %v2913_v4  ;;  %2723 = vmatpush2.bf16.msra.mxu1 %v2913_v4 }
  0xd9   : > { %v3590_v63 = vpop.f32.mrf.mxu0  ;;  %2088 = vmatprep.subr.bf16.mxu0 %v2918_v7  ;;  %2711 = vmatprep.subr.bf16.mxu1 %v2918_v7 }
  0xdb   : > { %v3592_v1 = vpop.f32.mrf.mxu0 }
  0xdc   : > { %2089 = vmatpush2.bf16.msra.mxu0 %v2916_v8  ;;  %2724 = vmatpush2.bf16.msra.mxu1 %v2916_v8 }
  0xdd   : > { %v3600_v5 = vpop.f32.mrf.mxu0  ;;  %2090 = vmatprep.subr.bf16.mxu0 %v2921_v11  ;;  %2712 = vmatprep.subr.bf16.mxu1 %v2921_v11 }
  0xdf   : > { %v3602_v6 = vpop.f32.mrf.mxu0 }
  0xe0   : > { %2091 = vmatpush2.bf16.msra.mxu0 %v2919_v12  ;;  %2725 = vmatpush2.bf16.msra.mxu1 %v2919_v12 }
  0xe1   : > { %v3610_v9 = vpop.f32.mrf.mxu0  ;;  %2092 = vmatprep.subr.bf16.mxu0 %v2924_v15  ;;  %2713 = vmatprep.subr.bf16.mxu1 %v2924_v15 }
  0xe3   : > { %v3612_v10 = vpop.f32.mrf.mxu0 }
  0xe4   : > { %2093 = vmatpush2.bf16.msra.mxu0 %v2922_v16  ;;  %2726 = vmatpush2.bf16.msra.mxu1 %v2922_v16 }
  0xe5   : > { %v3620_v13 = vpop.f32.mrf.mxu0 }
  0xe7   : > { %v3622_v14 = vpop.f32.mrf.mxu0 }
  0xe9   : > { %v3630_v17 = vpop.f32.mrf.mxu0 }
  0xeb   : > { %v3632_v18 = vpop.f32.mrf.mxu0 }
  0xed   : > { %v3634_v19 = vpop.f32.mrf.mxu0 }
  0xef   : > { %v3636_v20 = vpop.f32.mrf.mxu0 }
  0xf1   : > { %v3638_v21 = vpop.f32.mrf.mxu0 }
  0xf3   : > { %v3640_v22 = vpop.f32.mrf.mxu0 }
  0xf5   : > { %v3642_v23 = vpop.f32.mrf.mxu0 }
  0xf7   : > { %v3644_v24 = vpop.f32.mrf.mxu0 }
  0xf9   : > { %v3646_v25 = vpop.f32.mrf.mxu0 }
  0xfb   : > { %v3648_v26 = vpop.f32.mrf.mxu0 }
  0xfd   : > { %v3650_v27 = vpop.f32.mrf.mxu0 }
  0xff   : > { %v3652_v28 = vpop.f32.mrf.mxu0 }
 0x101   : > { %v3654_v29 = vpop.f32.mrf.mxu0 }
 0x103   : > { %v3656_v30 = vpop.f32.mrf.mxu0 }
 0x105   : > { %v3658_v31 = vpop.f32.mrf.mxu0 }
 0x107   : > { %v3660_v32 = vpop.f32.mrf.mxu0 }
 0x109   : > { %v3662_v33 = vpop.f32.mrf.mxu0 }
 0x10b   : > { %v3664_v34 = vpop.f32.mrf.mxu0 }
 0x10d   : > { %v3666_v36 = vpop.f32.mrf.mxu0 }
 0x10e   : > { %v1358_v35 = vpop.f32.mrf.mxu1 }
 0x10f   : > { %v3668_v38 = vpop.f32.mrf.mxu0  ;;  %v1359_v44 = vadd.f32 %v1358_v35, %v3582_v58 }
 0x110   : > { %v1360_v37 = vpop.f32.mrf.mxu1 }
 0x111   : > { %v3670_v40 = vpop.f32.mrf.mxu0  ;;  %v1361_v47 = vadd.f32 %v1360_v37, %v3588_v60 }
 0x112   : > { %v1362_v39 = vpop.f32.mrf.mxu1 }
 0x113   : > { %v3672_v42 = vpop.f32.mrf.mxu0  ;;  %v1363_v51 = vadd.f32 %v1362_v39, %v3590_v63 }
 0x114   : > { %v1364_v41 = vpop.f32.mrf.mxu1 }
 0x115   : > { %v1471_v45 = vpop.f32.mrf.mxu0  ;;  %v1365_v55 = vadd.f32 %v1364_v41, %v3592_v1 }
 0x116   : > { %v1368_v43 = vpop.f32.mrf.mxu1  ;;  %v3676_v48 = vadd.f32 %v1471_v45, %v1359_v44 }
 0x117   : > { %v1473_v49 = vpop.f32.mrf.mxu0  ;;  %v1369_v58 = vadd.f32 %v1368_v43, %v3600_v5 }
 0x118   : > { %v1370_v46 = vpop.f32.mrf.mxu1  ;;  %v3679_v52 = vadd.f32 %v1473_v49, %v1361_v47 }
 0x119   : > { %v1475_v53 = vpop.f32.mrf.mxu0  ;;  %v1371_v62 = vadd.f32 %v1370_v46, %v3602_v6 }
 0x11a   : > { %v1372_v50 = vpop.f32.mrf.mxu1  ;;  %v3682_v56 = vadd.f32 %v1475_v53, %v1363_v51 }
 0x11b   : > { %v1477_v3 = vpop.f32.mrf.mxu0  ;;  %v1373_v4 = vadd.f32 %v1372_v50, %v3610_v9 }
 0x11c   : > { %v1374_v54 = vpop.f32.mrf.mxu1  ;;  %v3685_v59 = vadd.f32 %v1477_v3, %v1365_v55 }
 0x11d   : > { %v1481_v60 = vpop.f32.mrf.mxu0  ;;  %v1375_v11 = vadd.f32 %v1374_v54, %v3612_v10 }
 0x11e   : > { %v1378_v57 = vpop.f32.mrf.mxu1  ;;  %v3688_v0 = vadd.f32 %v1481_v60, %v1369_v58 }
 0x11f   : > { %v1483_v63 = vpop.f32.mrf.mxu0  ;;  %v1379_v16 = vadd.f32 %v1378_v57, %v3620_v13 }
 0x120   : > { %v1380_v61 = vpop.f32.mrf.mxu1  ;;  %v3691_v7 = vadd.f32 %v1483_v63, %v1371_v62 }
 0x121   : > { %v1485_v1 = vpop.f32.mrf.mxu0  ;;  %v1381_v39 = vadd.f32 %v1380_v61, %v3622_v14 }
 0x122   : > { %v1382_v2 = vpop.f32.mrf.mxu1  ;;  %v3694_v12 = vadd.f32 %v1485_v1, %v1373_v4 }
 0x123   : > { %v1487_v5 = vpop.f32.mrf.mxu0  ;;  %v1383_v44 = vadd.f32 %v1382_v2, %v3630_v17 }
 0x124   : > { %v1384_v8 = vpop.f32.mrf.mxu1  ;;  %v3697_v35 = vadd.f32 %v1487_v5, %v1375_v11 }
 0x125   : > { %v1491_v6 = vpop.f32.mrf.mxu0  ;;  %v1385_v47 = vadd.f32 %v1384_v8, %v3632_v18 }
 0x126   : > { %v1388_v15 = vpop.f32.mrf.mxu1  ;;  %v3700_v41 = vadd.f32 %v1491_v6, %v1379_v16 }
 0x127   : > { %v1493_v9 = vpop.f32.mrf.mxu0  ;;  %v1389_v51 = vadd.f32 %v1388_v15, %v3634_v19 }
 0x128   : > { %v1390_v37 = vpop.f32.mrf.mxu1  ;;  %v3703_v45 = vadd.f32 %v1493_v9, %v1381_v39 }
 0x129   : > { %v1495_v10 = vpop.f32.mrf.mxu0  ;;  %v1391_v55 = vadd.f32 %v1390_v37, %v3636_v20 }
 0x12a   : > { %v1392_v43 = vpop.f32.mrf.mxu1  ;;  %v3706_v49 = vadd.f32 %v1495_v10, %v1383_v44 }
 0x12b   : > { %v1497_v13 = vpop.f32.mrf.mxu0  ;;  %v1393_v58 = vadd.f32 %v1392_v43, %v3638_v21 }
 0x12c   : > { %v1394_v46 = vpop.f32.mrf.mxu1  ;;  %v3709_v53 = vadd.f32 %v1497_v13, %v1385_v47 }
 0x12d   : > { %v1501_v14 = vpop.f32.mrf.mxu0  ;;  %v1395_v62 = vadd.f32 %v1394_v46, %v3640_v22 }
 0x12e   : > { %v1398_v50 = vpop.f32.mrf.mxu1  ;;  %v3712_v3 = vadd.f32 %v1501_v14, %v1389_v51 }
 0x12f   : > { %v1503_v17 = vpop.f32.mrf.mxu0  ;;  %v1399_v4 = vadd.f32 %v1398_v50, %v3642_v23 }
 0x130   : > { %v1400_v54 = vpop.f32.mrf.mxu1  ;;  %v3715_v60 = vadd.f32 %v1503_v17, %v1391_v55 }
 0x131   : > { %v1505_v18 = vpop.f32.mrf.mxu0  ;;  %v1401_v11 = vadd.f32 %v1400_v54, %v3644_v24 }
 0x132   : > { %v1402_v57 = vpop.f32.mrf.mxu1  ;;  %v3718_v63 = vadd.f32 %v1505_v18, %v1393_v58 }
 0x133   : > { %v1507_v19 = vpop.f32.mrf.mxu0  ;;  %v1403_v16 = vadd.f32 %v1402_v57, %v3646_v25 }
 0x134   : > { %v1404_v61 = vpop.f32.mrf.mxu1  ;;  %v3721_v1 = vadd.f32 %v1507_v19, %v1395_v62 }
 0x135   : > { %v1511_v20 = vpop.f32.mrf.mxu0  ;;  %v1405_v39 = vadd.f32 %v1404_v61, %v3648_v26 }
 0x136   : > { %v1408_v2 = vpop.f32.mrf.mxu1  ;;  %v3724_v5 = vadd.f32 %v1511_v20, %v1399_v4 }
 0x137   : > { %v1513_v21 = vpop.f32.mrf.mxu0  ;;  %v1409_v44 = vadd.f32 %v1408_v2, %v3650_v27 }
 0x138   : > { %v1410_v8 = vpop.f32.mrf.mxu1  ;;  %v3727_v6 = vadd.f32 %v1513_v21, %v1401_v11 }
 0x139   : > { %v1515_v22 = vpop.f32.mrf.mxu0  ;;  %v1411_v47 = vadd.f32 %v1410_v8, %v3652_v28 }
 0x13a   : > { %v1412_v15 = vpop.f32.mrf.mxu1  ;;  %v3730_v9 = vadd.f32 %v1515_v22, %v1403_v16 }
 0x13b   : > { %v1517_v23 = vpop.f32.mrf.mxu0  ;;  %v1413_v51 = vadd.f32 %v1412_v15, %v3654_v29 }
 0x13c   : > { %v1414_v37 = vpop.f32.mrf.mxu1  ;;  %v3733_v10 = vadd.f32 %v1517_v23, %v1405_v39 }
 0x13d   : > { %v1521_v24 = vpop.f32.mrf.mxu0  ;;  %v1415_v55 = vadd.f32 %v1414_v37, %v3656_v30 }
 0x13e   : > { %v1418_v43 = vpop.f32.mrf.mxu1  ;;  %v3736_v13 = vadd.f32 %v1521_v24, %v1409_v44 }
 0x13f   : > { %v1523_v25 = vpop.f32.mrf.mxu0  ;;  %v1419_v58 = vadd.f32 %v1418_v43, %v3658_v31 }
 0x140   : > { %v1420_v46 = vpop.f32.mrf.mxu1  ;;  %v3739_v14 = vadd.f32 %v1523_v25, %v1411_v47 }
 0x141   : > { %v1525_v26 = vpop.f32.mrf.mxu0  ;;  %v1421_v62 = vadd.f32 %v1420_v46, %v3660_v32 }
 0x142   : > { %v1422_v50 = vpop.f32.mrf.mxu1  ;;  %v3742_v17 = vadd.f32 %v1525_v26, %v1413_v51 }
 0x143   : > { %v1527_v27 = vpop.f32.mrf.mxu0  ;;  %v1423_v4 = vadd.f32 %v1422_v50, %v3662_v33 }
 0x144   : > { %v1424_v54 = vpop.f32.mrf.mxu1  ;;  %v3745_v18 = vadd.f32 %v1527_v27, %v1415_v55 }
 0x145   : > { %v1531_v28 = vpop.f32.mrf.mxu0  ;;  %v1425_v11 = vadd.f32 %v1424_v54, %v3664_v34 }
 0x146   : > { %v1428_v57 = vpop.f32.mrf.mxu1  ;;  %v3748_v19 = vadd.f32 %v1531_v28, %v1419_v58 }
 0x147   : > { %v1533_v29 = vpop.f32.mrf.mxu0  ;;  %v1429_v16 = vadd.f32 %v1428_v57, %v3666_v36  ;;  %v1778_v36 = vlaneseq }
 0x148   : > { %v1430_v61 = vpop.f32.mrf.mxu1  ;;  %v3751_v20 = vadd.f32 %v1533_v29, %v1421_v62 }
 0x149   : > { %v1535_v30 = vpop.f32.mrf.mxu0  ;;  %v1431_v39 = vadd.f32 %v1430_v61, %v3668_v38  ;;  %v1779_v55 = vshrl.u32 %v1778_v36, 7  ;;  %v1776_v61 = vld [vmem:[%s4062_s4] sm:$0x3] }
 0x14a   : > { %v1432_v2 = vpop.f32.mrf.mxu1  ;;  %v3754_v21 = vadd.f32 %v1535_v30, %v1423_v4 }
 0x14b   : > { %v1537_v31 = vpop.f32.mrf.mxu0  ;;  %v1433_v44 = vadd.f32 %v1432_v2, %v3670_v40  ;;  %v3778_v28 = vsub.s32 0, %v1779_v55  ;;  %v3786_v2 = vsub.s32 1, %v1779_v55 }
 0x14c   : > { %v1434_v8 = vpop.f32.mrf.mxu1  ;;  %v3757_v22 = vadd.f32 %v1537_v31, %v1425_v11 }
 0x14d   : > { %v1541_v32 = vpop.f32.mrf.mxu0  ;;  %v1435_v47 = vadd.f32 %v1434_v8, %v3672_v42  ;;  %v3792_v31 = vrot.slane %v1776_v61, %v3778_v28 }
 0x14e   : > { %v1594_v15 = vpop.f32.mrf.mxu1  ;;  %v3760_v23 = vadd.f32 %v1541_v32, %v1429_v16 }
 0x14f   : > { %v1543_v33 = vpop.f32.mrf.mxu0 }
 0x150   : > { %v1596_v37 = vpop.f32.mrf.mxu1  ;;  %v3763_v24 = vadd.f32 %v1543_v33, %v1431_v39 }
 0x151   : > { %v1545_v34 = vpop.f32.mrf.mxu0 }
 0x152   : > { %v1598_v43 = vpop.f32.mrf.mxu1  ;;  %v3766_v25 = vadd.f32 %v1545_v34, %v1433_v44  ;;  %v3798_v44 = vrot.slane %v1776_v61, %v3786_v2 }
 0x153   : > { %v1547_v50 = vpop.f32.mrf.mxu0 }
 0x154   : > { %v1600_v46 = vpop.f32.mrf.mxu1  ;;  %v3770_v26 = vadd.f32 %v1547_v50, %v1435_v47 }
 0x155   : > { %v1584_v38 = vpop.f32.mrf.mxu0 }
 0x156   : > { %v3768_v51 = vpop.f32.mrf.mxu1  ;;  %v1585_v29 = vadd.f32 %v1584_v38, %v3676_v48 }
 0x157   : > { %v1586_v27 = vpop.f32.mrf.mxu0 }
 0x158   : > { %v3772_v54 = vpop.f32.mrf.mxu1  ;;  %v1587_v8 = vadd.f32 %v1586_v27, %v3679_v52 }
 0x159   : > { %v1588_v57 = vpop.f32.mrf.mxu0 }
 0x15a   : > { %v3774_v40 = vpop.f32.mrf.mxu1  ;;  %v1589_v39 = vadd.f32 %v1588_v57, %v3682_v56  ;;  %v1595_v57 = vadd.f32 %v1594_v15, %v3688_v0 }
 0x15b   : > { %v1590_v42 = vpop.f32.mrf.mxu0 }
 0x15c   : > { %v3776_v58 = vpop.f32.mrf.mxu1  ;;  %v1591_v47 = vadd.f32 %v1590_v42, %v3685_v59 }
 0x15d   : > { %v1697_v4 = vpop.f32.mrf.mxu0 }
 0x15e   : > { %v3783_v62 = vpop.f32.mrf.mxu1  ;;  %v1698_v11 = vadd.f32 %v1697_v4, %v1585_v29  ;;  %v1597_v4 = vadd.f32 %v1596_v37, %v3691_v7  ;;  %v1601_v7 = vadd.f32 %v1600_v46, %v3697_v35  ;;  %v1607_v35 = vadd.f32 %v3772_v54, %v3703_v45 }
 0x15f   : > { %v1699_v16 = vpop.f32.mrf.mxu0 }
 0x160   : > { %v3788_v30 = vpop.f32.mrf.mxu1  ;;  %v1700_v33 = vadd.f32 %v1699_v16, %v1587_v8  ;;  %v1788_v52 = vadd.f32 %v3792_v31, %v1698_v11  ;;  %v1599_v11 = vadd.f32 %v1598_v43, %v3694_v12 }
 0x161   : > { %v1701_v48 = vpop.f32.mrf.mxu0 }
 0x162   : > { %v3794_v32 = vpop.f32.mrf.mxu1  ;;  %v1702_v36 = vadd.f32 %v1701_v48, %v1589_v39  ;;  %v1789_v55 = vadd.f32 %v3798_v44, %v1700_v33  ;;  %v1820_v8 = vmax.f32 %v1788_v52, 0.0 }
 0x163   : > { %v1703_v50 = vpop.f32.mrf.mxu0 }
 0x164   : > { %v3800_v34 = vpop.f32.mrf.mxu1  ;;  %v1790_v27 = vadd.f32 %v3792_v31, %v1702_v36  ;;  %v1704_v56 = vadd.f32 %v1703_v50, %v1591_v47  ;;  %v1821_v33 = vmax.f32 %v1789_v55, 0.0 }
 0x165   : > { %v1707_v61 = vpop.f32.mrf.mxu0 }
 0x166   : > { %v3804_v38 = vpop.f32.mrf.mxu1  ;;  %v1822_v59 = vmax.f32 %v1790_v27, 0.0  ;;  %v1791_v42 = vadd.f32 %v3798_v44, %v1704_v56  ;;  %v1708_v16 = vadd.f32 %v1707_v61, %v1595_v57  ;;  %v1605_v61 = vadd.f32 %v3768_v51, %v3700_v41 }
 0x167   : > { %v1709_v39 = vpop.f32.mrf.mxu0 }
 0x168   : > { %v3809_v29 = vpop.f32.mrf.mxu1  ;;  %v1852_v36 = vpack.c.bf16 %v1822_v59, %v1820_v8  ;;  %v1823_v47 = vmax.f32 %v1791_v42, 0.0  ;;  %v1710_v50 = vadd.f32 %v1709_v39, %v1597_v4  ;;  %v1792_v27 = vadd.f32 %v3792_v31, %v1708_v16 }
 0x169   : > { %v1711_v0 = vpop.f32.mrf.mxu0  ;;  %v1609_v39 = vadd.f32 %v3774_v40, %v3706_v49 }
 0x16a   : > { %v3814_v48 = vpop.f32.mrf.mxu1  ;;  %v1853_v37 = vpack.c.bf16 %v1823_v47, %v1821_v33  ;;  %v1712_v52 = vadd.f32 %v1711_v0, %v1599_v11  ;;  %v1793_v43 = vadd.f32 %v3798_v44, %v1710_v50  ;;  %v1824_v59 = vmax.f32 %v1792_v27, 0.0 }
 0x16b   : > { %v1713_v56 = vpop.f32.mrf.mxu0 }
 0x16c   : > { %v3816_v15 = vpop.f32.mrf.mxu1  ;;  %v1794_v55 = vadd.f32 %v3792_v31, %v1712_v52  ;;  %v1714_v57 = vadd.f32 %v1713_v56, %v1601_v7  ;;  %2658 = vmatprep.mubr.msk.bf16.mxu0 %vm2030_vm4, %v1853_v37  ;;  %v1825_v33 = vmax.f32 %v1793_v43, 0.0  ;;  %v1615_v52 = vadd.f32 %v3783_v62, %v3712_v3 }
 0x16d   : > { %v1717_v4 = vpop.f32.mrf.mxu0  ;;  %2095 = vmatmul.mubr.bf16.vlgmr.msra.gmra.mxu0 %v1852_v36  ;;  %v1611_v36 = vadd.f32 %v3776_v58, %v3709_v53  ;;  %v1617_v53 = vadd.f32 %v3788_v30, %v3715_v60  ;;  %v1619_v3 = vadd.f32 %v3794_v32, %v3718_v63 }
 0x16e   : > { %v3820_v12 = vpop.f32.mrf.mxu1  ;;  %v1826_v46 = vmax.f32 %v1794_v55, 0.0  ;;  %v1795_v8 = vadd.f32 %v3798_v44, %v1714_v57  ;;  %v1718_v42 = vadd.f32 %v1717_v4, %v1605_v61 }
 0x16f   : > { %v1719_v11 = vpop.f32.mrf.mxu0 }
 0x170   : > { %v3830_v16 = vpop.f32.mrf.mxu1  ;;  %v1827_v47 = vmax.f32 %v1795_v8, 0.0  ;;  %v1720_v50 = vadd.f32 %v1719_v11, %v1607_v35  ;;  %v1854_v51 = vpack.c.bf16 %v1826_v46, %v1824_v59  ;;  %v1796_v0 = vadd.f32 %v3792_v31, %v1718_v42 }
 0x171   : > { %v1721_v41 = vpop.f32.mrf.mxu0  ;;  %v1621_v42 = vadd.f32 %v3800_v34, %v3721_v1 }
 0x172   : > { %v1855_v45 = vpack.c.bf16 %v1827_v47, %v1825_v33  ;;  %v1722_v54 = vadd.f32 %v1721_v41, %v1609_v39  ;;  %v3837_v7 = vpop.f32.mrf.mxu1  ;;  %v1797_v49 = vadd.f32 %v3798_v44, %v1720_v50  ;;  %v1828_v57 = vmax.f32 %v1796_v0, 0.0 }
 0x173   : > { %v1723_v37 = vpop.f32.mrf.mxu0  ;;  %v1625_v47 = vadd.f32 %v3804_v38, %v3724_v5  ;;  %v1627_v41 = vadd.f32 %v3809_v29, %v3727_v6  ;;  %v1629_v5 = vadd.f32 %v3814_v48, %v3730_v9  ;;  %v1631_v6 = vadd.f32 %v3816_v15, %v3733_v10 }
 0x174   : > { %v1798_v40 = vadd.f32 %v3792_v31, %v1722_v54  ;;  %v1724_v27 = vadd.f32 %v1723_v37, %v1611_v36  ;;  %2659 = vmatprep.mubr.msk.bf16.mxu0 %vm2030_vm4, %v1855_v45  ;;  %v1640_v61 = vpop.f32.mrf.mxu1  ;;  %v1829_v62 = vmax.f32 %v1797_v49, 0.0 }
 0x175   : > { %v1727_v56 = vpop.f32.mrf.mxu0  ;;  %2105 = vmatmul.mubr.bf16.gmra.mxu0 %v1854_v51 }
 0x176   : > { %v1830_v58 = vmax.f32 %v1798_v40, 0.0  ;;  %v1799_v43 = vadd.f32 %v3798_v44, %v1724_v27  ;;  %v1728_v55 = vadd.f32 %v1727_v56, %v1615_v52  ;;  %v1644_v39 = vpop.f32.mrf.mxu1 }
 0x177   : > { %v1729_v4 = vpop.f32.mrf.mxu0 }
 0x178   : > { %v1831_v35 = vmax.f32 %v1799_v43, 0.0  ;;  %v1730_v46 = vadd.f32 %v1729_v4, %v1617_v53  ;;  %v1856_v59 = vpack.c.bf16 %v1830_v58, %v1828_v57  ;;  %v1800_v60 = vadd.f32 %v3792_v31, %v1728_v55  ;;  %v1646_v38 = vpop.f32.mrf.mxu1 }
 0x179   : > { %v1731_v8 = vpop.f32.mrf.mxu0  ;;  %v1635_v43 = vadd.f32 %v3820_v12, %v3736_v13  ;;  %v1637_v57 = vadd.f32 %v3830_v16, %v3739_v14  ;;  %v1639_v13 = vadd.f32 %v3837_v7, %v3742_v17 }
 0x17a   : > { %v1857_v11 = vpack.c.bf16 %v1831_v35, %v1829_v62  ;;  %v1732_v30 = vadd.f32 %v1731_v8, %v1619_v3  ;;  %v1801_v50 = vadd.f32 %v3798_v44, %v1730_v46  ;;  %v1832_v34 = vmax.f32 %v1800_v60, 0.0  ;;  %v1648_v53 = vpop.f32.mrf.mxu1 }
 0x17b   : > { %v1733_v33 = vpop.f32.mrf.mxu0  ;;  %v1641_v60 = vadd.f32 %v1640_v61, %v3745_v18 }
 0x17c   : > { %v1802_v63 = vadd.f32 %v3792_v31, %v1732_v30  ;;  %v1734_v32 = vadd.f32 %v1733_v33, %v1621_v42  ;;  %2660 = vmatprep.mubr.msk.bf16.mxu0 %vm2030_vm4, %v1857_v11  ;;  %v1833_v0 = vmax.f32 %v1801_v50, 0.0  ;;  %v1650_v12 = vpop.f32.mrf.mxu1  ;;  %v1645_v50 = vadd.f32 %v1644_v39, %v3748_v19 }
 0x17d   : > { %v1737_v1 = vpop.f32.mrf.mxu0  ;;  %2115 = vmatmul.mubr.bf16.gmra.mxu0 %v1856_v59 }
 0x17e   : > { %v1834_v51 = vmax.f32 %v1802_v63, 0.0  ;;  %v1803_v36 = vadd.f32 %v3798_v44, %v1734_v32  ;;  %v1738_v45 = vadd.f32 %v1737_v1, %v1625_v47  ;;  %v1654_v33 = vpop.f32.mrf.mxu1  ;;  %v1647_v32 = vadd.f32 %v1646_v38, %v3751_v20 }
 0x17f   : > { %v1739_v54 = vpop.f32.mrf.mxu0 }
 0x180   : > { %v1858_v37 = vpack.c.bf16 %v1834_v51, %v1832_v34  ;;  %v1835_v52 = vmax.f32 %v1803_v36, 0.0  ;;  %v1740_v49 = vadd.f32 %v1739_v54, %v1627_v41  ;;  %v1804_v27 = vadd.f32 %v3792_v31, %v1738_v45  ;;  %v1656_v36 = vpop.f32.mrf.mxu1 }
 0x181   : > { %v1741_v40 = vpop.f32.mrf.mxu0  ;;  %v1649_v51 = vadd.f32 %v1648_v53, %v3754_v21 }
 0x182   : > { %v1859_v29 = vpack.c.bf16 %v1835_v52, %v1833_v0  ;;  %v1742_v56 = vadd.f32 %v1741_v40, %v1629_v5  ;;  %v1805_v9 = vadd.f32 %v3798_v44, %v1740_v49  ;;  %v1836_v15 = vmax.f32 %v1804_v27, 0.0  ;;  %v1658_v49 = vpop.f32.mrf.mxu1 }
 0x183   : > { %v1743_v58 = vpop.f32.mrf.mxu0 }
 0x184   : > { %v1806_v48 = vadd.f32 %v3792_v31, %v1742_v56  ;;  %v1744_v55 = vadd.f32 %v1743_v58, %v1631_v6  ;;  %2661 = vmatprep.mubr.msk.bf16.mxu1 %vm2030_vm4, %v1859_v29  ;;  %v1837_v46 = vmax.f32 %v1805_v9, 0.0  ;;  %v1655_v6 = vadd.f32 %v1654_v33, %v3760_v23 }
 0x185   : > { %v1747_v10 = vpop.f32.mrf.mxu0  ;;  %2125 = vmatmul.mubr.bf16.vlgmr.msra.gmra.mxu1 %v1858_v37  ;;  %v1651_v37 = vadd.f32 %v1650_v12, %v3757_v22  ;;  %v1657_v56 = vadd.f32 %v1656_v36, %v3763_v24 }
 0x186   : > { %v1838_v4 = vmax.f32 %v1806_v48, 0.0  ;;  %v1807_v3 = vadd.f32 %v3798_v44, %v1744_v55  ;;  %v1748_v62 = vadd.f32 %v1747_v10, %v1635_v43  ;;  %v1659_v48 = vadd.f32 %v1658_v49, %v3766_v25  ;;  %v1660_v55 = vpop.f32.mrf.mxu1 }
 0x187   : > { %v1749_v35 = vpop.f32.mrf.mxu0 }
 0x188   : > { %v1839_v8 = vmax.f32 %v1807_v3, 0.0  ;;  %v1750_v59 = vadd.f32 %v1749_v35, %v1637_v57  ;;  %v1860_v42 = vpack.c.bf16 %v1838_v4, %v1836_v15  ;;  %v1808_v16 = vadd.f32 %v3792_v31, %v1748_v62 }
 0x189   : > { %v1751_v11 = vpop.f32.mrf.mxu0  ;;  %v1661_v62 = vadd.f32 %v1660_v55, %v3770_v26 }
 0x18a   : > { %v1861_v14 = vpack.c.bf16 %v1839_v8, %v1837_v46  ;;  %v1752_v30 = vadd.f32 %v1751_v11, %v1639_v13  ;;  %v1809_v63 = vadd.f32 %v3798_v44, %v1750_v59  ;;  %v1840_v18 = vmax.f32 %v1808_v16, 0.0 }
 0x18b   : > { %v1753_v47 = vpop.f32.mrf.mxu0 }
 0x18c   : > { %v1810_v17 = vadd.f32 %v3792_v31, %v1752_v30  ;;  %v1754_v7 = vadd.f32 %v1753_v47, %v1641_v60  ;;  %2662 = vmatprep.mubr.msk.bf16.mxu1 %vm2030_vm4, %v1861_v14  ;;  %v1841_v39 = vmax.f32 %v1809_v63, 0.0  ;;  %v1893_v30 = vld [vmem:[%s4064_s6] sm:$0x3] }
 0x18d   : > { %v1757_v41 = vpop.f32.mrf.mxu0  ;;  %2135 = vmatmul.mubr.bf16.gmra.mxu1 %v1860_v42  ;;  %v3907_v33 = vrot.slane %v1893_v30, %v3786_v2 }
 0x18e   : > { %v1842_v61 = vmax.f32 %v1810_v17, 0.0  ;;  %v1811_v1 = vadd.f32 %v3798_v44, %v1754_v7  ;;  %v1758_v34 = vadd.f32 %v1757_v41, %v1645_v50  ;;  %v2207_v50 = vld [vmem:[%s4065_s7] sm:$0x3] }
 0x18f   : > { %v1759_v19 = vpop.f32.mrf.mxu0  ;;  %v3915_v7 = vrot.slane %v2207_v50, %v3786_v2 }
 0x190   : > { %v1843_v45 = vmax.f32 %v1811_v1, 0.0  ;;  %v1760_v5 = vadd.f32 %v1759_v19, %v1647_v32  ;;  %v1862_v54 = vpack.c.bf16 %v1842_v61, %v1840_v18  ;;  %v1812_v20 = vadd.f32 %v3792_v31, %v1758_v34 }
 0x191   : > { %v1761_v0 = vpop.f32.mrf.mxu0  ;;  %v3918_v18 = vrot.slane %v2207_v50, %v3778_v28 }
 0x192   : > { %v1863_v52 = vpack.c.bf16 %v1843_v45, %v1841_v39  ;;  %v1762_v38 = vadd.f32 %v1761_v0, %v1649_v51  ;;  %v1813_v29 = vadd.f32 %v3798_v44, %v1760_v5  ;;  %v1844_v22 = vmax.f32 %v1812_v20, 0.0 }
 0x193   : > { %v1763_v40 = vpop.f32.mrf.mxu0 }
 0x194   : > { %v1814_v21 = vadd.f32 %v3792_v31, %v1762_v38  ;;  %v1764_v27 = vadd.f32 %v1763_v40, %v1651_v37  ;;  %2663 = vmatprep.mubr.msk.bf16.mxu1 %vm2030_vm4, %v1863_v52  ;;  %v1845_v57 = vmax.f32 %v1813_v29, 0.0 }
 0x195   : > { %v1767_v53 = vpop.f32.mrf.mxu0  ;;  %2145 = vmatmul.mubr.bf16.gmra.mxu1 %v1862_v54 }
 0x196   : > { %v1846_v58 = vmax.f32 %v1814_v21, 0.0  ;;  %v1815_v43 = vadd.f32 %v3798_v44, %v1764_v27  ;;  %v1768_v9 = vadd.f32 %v1767_v53, %v1655_v6 }
 0x197   : > { %v1769_v23 = vpop.f32.mrf.mxu0 }
 0x198   : > { %v1847_v10 = vmax.f32 %v1815_v43, 0.0  ;;  %v1770_v15 = vadd.f32 %v1769_v23, %v1657_v56  ;;  %v1864_v4 = vpack.c.bf16 %v1846_v58, %v1844_v22  ;;  %v1816_v24 = vadd.f32 %v3792_v31, %v1768_v9 }
 0x199   : > { %v1771_v3 = vpop.f32.mrf.mxu0 }
 0x19a   : > { %v1865_v13 = vpack.c.bf16 %v1847_v10, %v1845_v57  ;;  %v1772_v12 = vadd.f32 %v1771_v3, %v1659_v48  ;;  %v1817_v46 = vadd.f32 %v3798_v44, %v1770_v15  ;;  %v1848_v25 = vmax.f32 %v1816_v24, 0.0 }
 0x19b   : > { %v1773_v35 = vpop.f32.mrf.mxu0 }
 0x19c   : > { %v1818_v8 = vadd.f32 %v3792_v31, %v1772_v12  ;;  %v1774_v59 = vadd.f32 %v1773_v35, %v1661_v62  ;;  %2664 = vmatprep.mubr.msk.bf16.mxu1 %vm2030_vm4, %v1865_v13  ;;  %v1849_v60 = vmax.f32 %v1817_v46, 0.0  ;;  %v3904_v31 = vrot.slane %v1893_v30, %v3778_v28 }
 0x19d   : > { %2155 = vmatmul.mubr.bf16.gmra.mxu1 %v1864_v4 }
 0x19e   : > { %v1850_v42 = vmax.f32 %v1818_v8, 0.0  ;;  %v1819_v11 = vadd.f32 %v3798_v44, %v1774_v59 }
 0x1a0   : > { %v1851_v14 = vmax.f32 %v1819_v11, 0.0  ;;  %v1866_v26 = vpack.c.bf16 %v1850_v42, %v1848_v25 }
 0x1a2   : > { %v1867_v16 = vpack.c.bf16 %v1851_v14, %v1849_v60 }
 0x1a4   : > { %2665 = vmatprep.mubr.msk.bf16.mxu1 %vm2030_vm4, %v1867_v16 }
 0x1a5   : > { %2165 = vmatmul.mubr.bf16.gmra.mxu1 %v1866_v26 }
 0x22d   : > { %v2096_v47 = vpop.f32.mrf.mxu0 }
 0x22e   : > { %v2097_v44 = vadd.f32 %v2096_v47, %v3904_v31 }
 0x22f   : > { %v2098_v63 = vpop.f32.mrf.mxu0 }
 0x230   : > { %v2099_v17 = vadd.f32 %v2098_v63, %v3907_v33  ;;  %v2175_v32 = vmax.f32 %v2097_v44, 0.0 }
 0x231   : > { %v2100_v41 = vpop.f32.mrf.mxu0 }
 0x232   : > { %v2176_v61 = vmax.f32 %v2099_v17, 0.0  ;;  %v2101_v1 = vadd.f32 %v2100_v41, %v3904_v31  ;;  %v2219_v45 = vmul.f32 %v3918_v18, %v2175_v32 }
 0x233   : > { %v2102_v34 = vpop.f32.mrf.mxu0 }
 0x234   : > { %v2103_v51 = vadd.f32 %v2102_v34, %v3907_v33  ;;  %v2220_v36 = vmul.f32 %v3915_v7, %v2176_v61  ;;  %v2177_v19 = vmax.f32 %v2101_v1, 0.0 }
 0x235   : > { %v2106_v39 = vpop.f32.mrf.mxu0 }
 0x236   : > { %v2178_v5 = vmax.f32 %v2103_v51, 0.0  ;;  %v2107_v2 = vadd.f32 %v2106_v39, %v3904_v31  ;;  %v2251_v54 = vsel %vm2030_vm4, %v2220_v36, 0.0  ;;  %v2221_v20 = vmul.f32 %v3918_v18, %v2177_v19 }
 0x237   : > { %v2108_v0 = vpop.f32.mrf.mxu0  ;;  %v2252_v28 = vadd.f32 %v2251_v54, %v2219_v45 }
 0x238   : > { %v2222_v37 = vmul.f32 %v3915_v7, %v2178_v5  ;;  %v2109_v52 = vadd.f32 %v2108_v0, %v3907_v33  ;;  %v2179_v38 = vmax.f32 %v2107_v2, 0.0 }
 0x239   : > { %v2110_v49 = vpop.f32.mrf.mxu0  ;;  %2253 = vadd.xlane.f32.xlu0 %v2252_v28 }
 0x23a   : > { %v2180_v40 = vmax.f32 %v2109_v52, 0.0  ;;  %v2111_v6 = vadd.f32 %v2110_v49, %v3904_v31  ;;  %v2255_v29 = vsel %vm2030_vm4, %v2222_v37, 0.0  ;;  %v2223_v43 = vmul.f32 %v3918_v18, %v2179_v38 }
 0x23b   : > { %v2112_v21 = vpop.f32.mrf.mxu0  ;;  %v2256_v27 = vadd.f32 %v2255_v29, %v2221_v20 }
 0x23c   : > { %v2113_v56 = vadd.f32 %v2112_v21, %v3907_v33  ;;  %v2224_v53 = vmul.f32 %v3915_v7, %v2180_v40  ;;  %v2181_v22 = vmax.f32 %v2111_v6, 0.0 }
 0x23d   : > { %v2116_v58 = vpop.f32.mrf.mxu0  ;;  %2257 = vadd.xlane.f32.xlu0 %v2256_v27 }
 0x23e   : > { %v2182_v9 = vmax.f32 %v2113_v56, 0.0  ;;  %v2117_v48 = vadd.f32 %v2116_v58, %v3904_v31  ;;  %v2259_v55 = vsel %vm2030_vm4, %v2224_v53, 0.0  ;;  %v2225_v4 = vmul.f32 %v3918_v18, %v2181_v22 }
 0x23f   : > { %v2118_v23 = vpop.f32.mrf.mxu0  ;;  %v2260_v57 = vadd.f32 %v2259_v55, %v2223_v43 }
 0x240   : > { %v2226_v10 = vmul.f32 %v3915_v7, %v2182_v9  ;;  %v2119_v15 = vadd.f32 %v2118_v23, %v3907_v33  ;;  %v2183_v3 = vmax.f32 %v2117_v48, 0.0 }
 0x241   : > { %v2120_v62 = vpop.f32.mrf.mxu0  ;;  %2261 = vadd.xlane.f32.xlu1 %v2260_v57 }
 0x242   : > { %v2184_v13 = vmax.f32 %v2119_v15, 0.0  ;;  %v2121_v24 = vadd.f32 %v2120_v62, %v3904_v31  ;;  %v2263_v12 = vsel %vm2030_vm4, %v2226_v10, 0.0  ;;  %v2227_v25 = vmul.f32 %v3918_v18, %v2183_v3 }
 0x243   : > { %v2122_v35 = vpop.f32.mrf.mxu0  ;;  %v2264_v46 = vadd.f32 %v2263_v12, %v2225_v4 }
 0x244   : > { %v2228_v8 = vmul.f32 %v3915_v7, %v2184_v13  ;;  %v2123_v59 = vadd.f32 %v2122_v35, %v3907_v33  ;;  %v2185_v42 = vmax.f32 %v2121_v24, 0.0 }
 0x245   : > { %v2126_v11 = vpop.f32.mrf.mxu1  ;;  %2265 = vadd.xlane.f32.xlu1 %v2264_v46 }
 0x246   : > { %v2186_v60 = vmax.f32 %v2123_v59, 0.0  ;;  %v2127_v14 = vadd.f32 %v2126_v11, %v3904_v31  ;;  %v2267_v26 = vsel %vm2030_vm4, %v2228_v8, 0.0  ;;  %v2229_v50 = vmul.f32 %v3918_v18, %v2185_v42 }
 0x247   : > { %v2128_v16 = vpop.f32.mrf.mxu1  ;;  %v2268_v30 = vadd.f32 %v2267_v26, %v2227_v25 }
 0x248   : > { %v2230_v47 = vmul.f32 %v3915_v7, %v2186_v60  ;;  %v2129_v44 = vadd.f32 %v2128_v16, %v3907_v33  ;;  %v2187_v63 = vmax.f32 %v2127_v14, 0.0 }
 0x249   : > { %v2130_v17 = vpop.f32.mrf.mxu1  ;;  %2269 = vadd.xlane.f32.xlu0 %v2268_v30 }
 0x24a   : > { %v2188_v32 = vmax.f32 %v2129_v44, 0.0  ;;  %v2131_v41 = vadd.f32 %v2130_v17, %v3904_v31  ;;  %v2271_v61 = vsel %vm2030_vm4, %v2230_v47, 0.0  ;;  %v2231_v19 = vmul.f32 %v3918_v18, %v2187_v63 }
 0x24b   : > { %v2132_v1 = vpop.f32.mrf.mxu1  ;;  %v2272_v34 = vadd.f32 %v2271_v61, %v2229_v50 }
 0x24c   : > { %v2232_v51 = vmul.f32 %v3915_v7, %v2188_v32  ;;  %v2133_v36 = vadd.f32 %v2132_v1, %v3907_v33  ;;  %v2189_v39 = vmax.f32 %v2131_v41, 0.0 }
 0x24d   : > { %v2136_v45 = vpop.f32.mrf.mxu1  ;;  %2273 = vadd.xlane.f32.xlu1 %v2272_v34 }
 0x24e   : > { %v2190_v5 = vmax.f32 %v2133_v36, 0.0  ;;  %v2137_v2 = vadd.f32 %v2136_v45, %v3904_v31  ;;  %v2275_v54 = vsel %vm2030_vm4, %v2232_v51, 0.0  ;;  %v2233_v20 = vmul.f32 %v3918_v18, %v2189_v39 }
 0x24f   : > { %v2138_v0 = vpop.f32.mrf.mxu1  ;;  %v2276_v28 = vadd.f32 %v2275_v54, %v2231_v19 }
 0x250   : > { %v2234_v37 = vmul.f32 %v3915_v7, %v2190_v5  ;;  %v2139_v52 = vadd.f32 %v2138_v0, %v3907_v33  ;;  %v2191_v38 = vmax.f32 %v2137_v2, 0.0 }
 0x251   : > { %v2140_v49 = vpop.f32.mrf.mxu1  ;;  %2277 = vadd.xlane.f32.xlu0 %v2276_v28 }
 0x252   : > { %v2192_v40 = vmax.f32 %v2139_v52, 0.0  ;;  %v2141_v6 = vadd.f32 %v2140_v49, %v3904_v31  ;;  %v2279_v29 = vsel %vm2030_vm4, %v2234_v37, 0.0  ;;  %v2235_v22 = vmul.f32 %v3918_v18, %v2191_v38 }
 0x253   : > { %v2142_v21 = vpop.f32.mrf.mxu1  ;;  %v2280_v27 = vadd.f32 %v2279_v29, %v2233_v20 }
 0x254   : > { %v2236_v56 = vmul.f32 %v3915_v7, %v2192_v40  ;;  %v2143_v53 = vadd.f32 %v2142_v21, %v3907_v33  ;;  %v2193_v58 = vmax.f32 %v2141_v6, 0.0 }
 0x255   : > { %v2146_v43 = vpop.f32.mrf.mxu1  ;;  %2281 = vadd.xlane.f32.xlu1 %v2280_v27 }
 0x256   : > { %v2194_v9 = vmax.f32 %v2143_v53, 0.0  ;;  %v2147_v48 = vadd.f32 %v2146_v43, %v3904_v31  ;;  %v2283_v55 = vsel %vm2030_vm4, %v2236_v56, 0.0  ;;  %v2237_v4 = vmul.f32 %v3918_v18, %v2193_v58 }
 0x257   : > { %v2148_v23 = vpop.f32.mrf.mxu1  ;;  %v2284_v57 = vadd.f32 %v2283_v55, %v2235_v22 }
 0x258   : > { %v2238_v10 = vmul.f32 %v3915_v7, %v2194_v9  ;;  %v2149_v15 = vadd.f32 %v2148_v23, %v3907_v33  ;;  %v2195_v3 = vmax.f32 %v2147_v48, 0.0 }
 0x259   : > { %v2150_v62 = vpop.f32.mrf.mxu1  ;;  %2285 = vadd.xlane.f32.xlu0 %v2284_v57 }
 0x25a   : > { %v2196_v13 = vmax.f32 %v2149_v15, 0.0  ;;  %v2151_v24 = vadd.f32 %v2150_v62, %v3904_v31  ;;  %v2287_v12 = vsel %vm2030_vm4, %v2238_v10, 0.0  ;;  %v2239_v25 = vmul.f32 %v3918_v18, %v2195_v3  ;;  %v3998_v10 = vld [vmem:[#allocation2] ss:$0 sm:$0xff] }
 0x25b   : > { %v2152_v35 = vpop.f32.mrf.mxu1  ;;  %v2288_v46 = vadd.f32 %v2287_v12, %v2237_v4 }
 0x25c   : > { %v2240_v8 = vmul.f32 %v3915_v7, %v2196_v13  ;;  %v2153_v59 = vadd.f32 %v2152_v35, %v3907_v33  ;;  %v2197_v42 = vmax.f32 %v2151_v24, 0.0 }
 0x25d   : > { %v2156_v11 = vpop.f32.mrf.mxu1  ;;  %2289 = vadd.xlane.f32.xlu1 %v2288_v46 }
 0x25e   : > { %v2198_v60 = vmax.f32 %v2153_v59, 0.0  ;;  %v2157_v14 = vadd.f32 %v2156_v11, %v3904_v31  ;;  %v2291_v26 = vsel %vm2030_vm4, %v2240_v8, 0.0  ;;  %v2241_v50 = vmul.f32 %v3918_v18, %v2197_v42 }
 0x25f   : > { %v2158_v16 = vpop.f32.mrf.mxu1  ;;  %v2292_v30 = vadd.f32 %v2291_v26, %v2239_v25 }
 0x260   : > { %v2242_v47 = vmul.f32 %v3915_v7, %v2198_v60  ;;  %v2159_v44 = vadd.f32 %v2158_v16, %v3907_v33  ;;  %v2199_v63 = vmax.f32 %v2157_v14, 0.0 }
 0x261   : > { %v2160_v17 = vpop.f32.mrf.mxu1  ;;  %2293 = vadd.xlane.f32.xlu0 %v2292_v30 }
 0x262   : > { %v2200_v32 = vmax.f32 %v2159_v44, 0.0  ;;  %v2161_v41 = vadd.f32 %v2160_v17, %v3904_v31  ;;  %v2295_v61 = vsel %vm2030_vm4, %v2242_v47, 0.0  ;;  %v2243_v19 = vmul.f32 %v3918_v18, %v2199_v63 }
 0x263   : > { %v2162_v1 = vpop.f32.mrf.mxu1  ;;  %v2296_v34 = vadd.f32 %v2295_v61, %v2241_v50 }
 0x264   : > { %v2244_v51 = vmul.f32 %v3915_v7, %v2200_v32  ;;  %v2163_v36 = vadd.f32 %v2162_v1, %v3907_v33  ;;  %v2201_v39 = vmax.f32 %v2161_v41, 0.0 }
 0x265   : > { %v2166_v45 = vpop.f32.mrf.mxu1  ;;  %2297 = vadd.xlane.f32.xlu1 %v2296_v34 }
 0x266   : > { %v2202_v5 = vmax.f32 %v2163_v36, 0.0  ;;  %v2167_v2 = vadd.f32 %v2166_v45, %v3904_v31  ;;  %v2299_v54 = vsel %vm2030_vm4, %v2244_v51, 0.0  ;;  %v2245_v20 = vmul.f32 %v3918_v18, %v2201_v39 }
 0x267   : > { %v2168_v0 = vpop.f32.mrf.mxu1  ;;  %v2300_v28 = vadd.f32 %v2299_v54, %v2243_v19 }
 0x268   : > { %v2246_v37 = vmul.f32 %v3915_v7, %v2202_v5  ;;  %v2169_v52 = vadd.f32 %v2168_v0, %v3907_v33  ;;  %v2203_v38 = vmax.f32 %v2167_v2, 0.0 }
 0x269   : > { %v2170_v49 = vpop.f32.mrf.mxu1  ;;  %2301 = vadd.xlane.f32.xlu0 %v2300_v28 }
 0x26a   : > { %v2204_v40 = vmax.f32 %v2169_v52, 0.0  ;;  %v2171_v6 = vadd.f32 %v2170_v49, %v3904_v31  ;;  %v2303_v29 = vsel %vm2030_vm4, %v2246_v37, 0.0  ;;  %v2247_v22 = vmul.f32 %v3918_v18, %v2203_v38 }
 0x26b   : > { %v2172_v21 = vpop.f32.mrf.mxu1  ;;  %v2304_v27 = vadd.f32 %v2303_v29, %v2245_v20 }
 0x26c   : > { %v2248_v56 = vmul.f32 %v3915_v7, %v2204_v40  ;;  %v2173_v53 = vadd.f32 %v2172_v21, %v3907_v33  ;;  %v2205_v58 = vmax.f32 %v2171_v6, 0.0 }
 0x26d   : > { %2305 = vadd.xlane.f32.xlu1 %v2304_v27 }
 0x26e   : > { %v2206_v43 = vmax.f32 %v2173_v53, 0.0  ;;  %v2307_v9 = vsel %vm2030_vm4, %v2248_v56, 0.0  ;;  %v2249_v31 = vmul.f32 %v3918_v18, %v2205_v58 }
 0x26f   : > { %v2308_v48 = vadd.f32 %v2307_v9, %v2247_v22 }
 0x270   : > { %v2250_v55 = vmul.f32 %v3915_v7, %v2206_v43 }
 0x271   : > { %2309 = vadd.xlane.f32.xlu0 %v2308_v48 }
 0x272   : > { %v2311_v23 = vsel %vm2030_vm4, %v2250_v55, 0.0 }
 0x273   : > { %v2312_v57 = vadd.f32 %v2311_v23, %v2249_v31 }
 0x275   : > { %2313 = vadd.xlane.f32.xlu1 %v2312_v57 }
 0x2c2   : > { %v2254_v33 = vpop.xlane.xlu0 %2253 }
 0x2c3   : > { %v2322_v15 = vadd.f32 %v3998_v10, %v2254_v33 }
 0x2c5   : > { %v2338_v4 = vsub.f32 0.0, %v2322_v15 }
 0x2c6   : > { %v2258_v3 = vpop.xlane.xlu0 %2257 }
 0x2c7   : > { %v2354_v62 = vmul.f32 1.442695, %v2338_v4  ;;  %v2323_v13 = vadd.f32 %v3998_v10, %v2258_v3 }
 0x2c9   : > { %2925 = vpow2.f32 %v2354_v62  ;;  %v2339_v24 = vsub.f32 0.0, %v2323_v13 }
 0x2ca   : > { %v2262_v7 = vpop.xlane.xlu1 %2261 }
 0x2cb   : > { %v2356_v12 = vmul.f32 1.442695, %v2339_v24  ;;  %v2324_v18 = vadd.f32 %v3998_v10, %v2262_v7 }
 0x2cd   : > { %2927 = vpow2.f32 %v2356_v12  ;;  %v2340_v35 = vsub.f32 0.0, %v2324_v18 }
 0x2ce   : > { %v2266_v46 = vpop.xlane.xlu1 %2265 }
 0x2cf   : > { %v2358_v8 = vmul.f32 1.442695, %v2340_v35  ;;  %v2325_v59 = vadd.f32 %v3998_v10, %v2266_v46 }
 0x2d1   : > { %2929 = vpow2.f32 %v2358_v8  ;;  %v2341_v25 = vsub.f32 0.0, %v2325_v59 }
 0x2d2   : > { %v2270_v42 = vpop.xlane.xlu0 %2269 }
 0x2d3   : > { %v2360_v11 = vmul.f32 1.442695, %v2341_v25  ;;  %v2326_v60 = vadd.f32 %v3998_v10, %v2270_v42 }
 0x2d5   : > { %2931 = vpow2.f32 %v2360_v11  ;;  %v2342_v14 = vsub.f32 0.0, %v2326_v60 }
 0x2d6   : > { %v2926_v26 = vpop.eup %2925  ;;  %v2274_v16 = vpop.xlane.xlu1 %2273 }
 0x2d7   : > { %v2386_v30 = vadd.f32 1.0, %v2926_v26  ;;  %v2362_v47 = vmul.f32 1.442695, %v2342_v14  ;;  %v2327_v44 = vadd.f32 %v3998_v10, %v2274_v16 }
 0x2d9   : > { %2933 = vrcp.f32 %v2386_v30  ;;  %v2343_v50 = vsub.f32 0.0, %v2327_v44 }
 0x2da   : > { %v2928_v63 = vpop.eup %2927  ;;  %2935 = vpow2.f32 %v2362_v47  ;;  %v2278_v17 = vpop.xlane.xlu0 %2277 }
 0x2db   : > { %v2387_v32 = vadd.f32 1.0, %v2928_v63  ;;  %v2364_v41 = vmul.f32 1.442695, %v2343_v50  ;;  %v2328_v61 = vadd.f32 %v3998_v10, %v2278_v17 }
 0x2dd   : > { %2937 = vrcp.f32 %v2387_v32  ;;  %v2344_v1 = vsub.f32 0.0, %v2328_v61 }
 0x2de   : > { %v2930_v34 = vpop.eup %2929  ;;  %2939 = vpow2.f32 %v2364_v41  ;;  %v2282_v51 = vpop.xlane.xlu1 %2281 }
 0x2df   : > { %v2388_v36 = vadd.f32 1.0, %v2930_v34  ;;  %v2366_v19 = vmul.f32 1.442695, %v2344_v1  ;;  %v2329_v39 = vadd.f32 %v3998_v10, %v2282_v51 }
 0x2e1   : > { %2941 = vrcp.f32 %v2388_v36  ;;  %v2345_v45 = vsub.f32 0.0, %v2329_v39 }
 0x2e2   : > { %v2932_v5 = vpop.eup %2931  ;;  %2943 = vpow2.f32 %v2366_v19  ;;  %v2286_v2 = vpop.xlane.xlu0 %2285 }
 0x2e3   : > { %v2389_v54 = vadd.f32 1.0, %v2932_v5  ;;  %v2368_v0 = vmul.f32 1.442695, %v2345_v45  ;;  %v2330_v28 = vadd.f32 %v3998_v10, %v2286_v2 }
 0x2e5   : > { %2945 = vrcp.f32 %v2389_v54  ;;  %v2346_v37 = vsub.f32 0.0, %v2330_v28 }
 0x2e6   : > { %v2934_v52 = vpop.eup %2933  ;;  %2947 = vpow2.f32 %v2368_v0  ;;  %v2290_v20 = vpop.xlane.xlu1 %2289 }
 0x2e7   : > { %v2936_v38 = vpop.eup %2935  ;;  %2419 = vst.msk [vmem:[%s4014_s25] sm:$0xff] %vm2418_vm5, %v2934_v52  ;;  %v2370_v49 = vmul.f32 1.442695, %v2346_v37  ;;  %v2331_v40 = vadd.f32 %v3998_v10, %v2290_v20 }
 0x2e8   : > { %v2390_v6 = vadd.f32 1.0, %v2936_v38 }
 0x2e9   : > { %2949 = vpow2.f32 %v2370_v49  ;;  %v2347_v29 = vsub.f32 0.0, %v2331_v40 }
 0x2ea   : > { %v2938_v21 = vpop.eup %2937  ;;  %2951 = vrcp.f32 %v2390_v6  ;;  %v2294_v27 = vpop.xlane.xlu0 %2293 }
 0x2eb   : > { %v2940_v56 = vpop.eup %2939  ;;  %2420 = vst.msk [vmem:[%s4014_s25 + $0x8] sm:$0xff] %vm2418_vm5, %v2938_v21  ;;  %v2372_v53 = vmul.f32 1.442695, %v2347_v29  ;;  %v2332_v22 = vadd.f32 %v3998_v10, %v2294_v27 }
 0x2ec   : > { %v2391_v58 = vadd.f32 1.0, %v2940_v56 }
 0x2ed   : > { %2953 = vpow2.f32 %v2372_v53  ;;  %v2348_v43 = vsub.f32 0.0, %v2332_v22 }
 0x2ee   : > { %v2942_v9 = vpop.eup %2941  ;;  %2955 = vrcp.f32 %v2391_v58  ;;  %v2298_v48 = vpop.xlane.xlu1 %2297 }
 0x2ef   : > { %v2944_v55 = vpop.eup %2943  ;;  %2421 = vst.msk [vmem:[%s4014_s25 + $0x10] sm:$0xff] %vm2418_vm5, %v2942_v9  ;;  %v2374_v31 = vmul.f32 1.442695, %v2348_v43  ;;  %v2333_v23 = vadd.f32 %v3998_v10, %v2298_v48 }
 0x2f0   : > { %v2392_v57 = vadd.f32 1.0, %v2944_v55 }
 0x2f1   : > { %2957 = vpow2.f32 %v2374_v31  ;;  %v2349_v33 = vsub.f32 0.0, %v2333_v23 }
 0x2f2   : > { %v2946_v15 = vpop.eup %2945  ;;  %2959 = vrcp.f32 %v2392_v57  ;;  %v2302_v4 = vpop.xlane.xlu0 %2301 }
 0x2f3   : > { %v2948_v3 = vpop.eup %2947  ;;  %2422 = vst.msk [vmem:[%s4014_s25 + $0x18] sm:$0xff] %vm2418_vm5, %v2946_v15  ;;  %v2376_v62 = vmul.f32 1.442695, %v2349_v33  ;;  %v2334_v13 = vadd.f32 %v3998_v10, %v2302_v4 }
 0x2f4   : > { %v2393_v24 = vadd.f32 1.0, %v2948_v3 }
 0x2f5   : > { %2961 = vpow2.f32 %v2376_v62  ;;  %v2350_v7 = vsub.f32 0.0, %v2334_v13 }
 0x2f6   : > { %v2950_v12 = vpop.eup %2949  ;;  %2963 = vrcp.f32 %v2393_v24  ;;  %v2306_v18 = vpop.xlane.xlu1 %2305 }
 0x2f7   : > { %v2952_v35 = vpop.eup %2951  ;;  %v2394_v46 = vadd.f32 1.0, %v2950_v12  ;;  %v2378_v8 = vmul.f32 1.442695, %v2350_v7  ;;  %v2335_v59 = vadd.f32 %v3998_v10, %v2306_v18 }
 0x2f8   : > { %2423 = vst.msk [vmem:[%s4014_s25 + $0x20] sm:$0xff] %vm2418_vm5, %v2952_v35 }
 0x2f9   : > { %2965 = vrcp.f32 %v2394_v46  ;;  %v2351_v25 = vsub.f32 0.0, %v2335_v59 }
 0x2fa   : > { %v2954_v42 = vpop.eup %2953  ;;  %2967 = vpow2.f32 %v2378_v8  ;;  %v2310_v11 = vpop.xlane.xlu0 %2309 }
 0x2fb   : > { %v2956_v60 = vpop.eup %2955  ;;  %v2395_v14 = vadd.f32 1.0, %v2954_v42  ;;  %v2380_v26 = vmul.f32 1.442695, %v2351_v25  ;;  %v2336_v16 = vadd.f32 %v3998_v10, %v2310_v11 }
 0x2fc   : > { %2424 = vst.msk [vmem:[%s4014_s25 + $0x28] sm:$0xff] %vm2418_vm5, %v2956_v60 }
 0x2fd   : > { %2969 = vrcp.f32 %v2395_v14  ;;  %v2352_v30 = vsub.f32 0.0, %v2336_v16 }
 0x2fe   : > { %v2958_v47 = vpop.eup %2957  ;;  %2971 = vpow2.f32 %v2380_v26  ;;  %v2314_v44 = vpop.xlane.xlu1 %2313 }
 0x2ff   : > { %v2960_v50 = vpop.eup %2959  ;;  %v2396_v63 = vadd.f32 1.0, %v2958_v47  ;;  %v2382_v17 = vmul.f32 1.442695, %v2352_v30  ;;  %v2337_v32 = vadd.f32 %v3998_v10, %v2314_v44 }
 0x300   : > { %2425 = vst.msk [vmem:[%s4014_s25 + $0x30] sm:$0xff] %vm2418_vm5, %v2960_v50 }
 0x301   : > { %2973 = vrcp.f32 %v2396_v63  ;;  %v2353_v41 = vsub.f32 0.0, %v2337_v32 }
 0x302   : > { %v2962_v61 = vpop.eup %2961  ;;  %2975 = vpow2.f32 %v2382_v17 }
 0x303   : > { %v2964_v1 = vpop.eup %2963  ;;  %v2397_v34 = vadd.f32 1.0, %v2962_v61  ;;  %v2384_v51 = vmul.f32 1.442695, %v2353_v41 }
 0x304   : > { %2426 = vst.msk [vmem:[%s4014_s25 + $0x38] sm:$0xff] %vm2418_vm5, %v2964_v1 }
 0x305   : > { %2977 = vrcp.f32 %v2397_v34 }
 0x306   : > { %v2966_v36 = vpop.eup %2965  ;;  %2979 = vpow2.f32 %v2384_v51 }
 0x307   : > { %v2968_v19 = vpop.eup %2967  ;;  %2427 = vst.msk [vmem:[%s4014_s25 + $0x40] sm:$0xff] %vm2418_vm5, %v2966_v36 }
 0x308   : > { %v2398_v10 = vadd.f32 1.0, %v2968_v19 }
 0x30a   : > { %v2970_v39 = vpop.eup %2969  ;;  %2981 = vrcp.f32 %v2398_v10 }
 0x30b   : > { %v2972_v45 = vpop.eup %2971  ;;  %2428 = vst.msk [vmem:[%s4014_s25 + $0x48] sm:$0xff] %vm2418_vm5, %v2970_v39 }
 0x30c   : > { %v2399_v5 = vadd.f32 1.0, %v2972_v45 }
 0x30e   : > { %v2974_v2 = vpop.eup %2973  ;;  %2983 = vrcp.f32 %v2399_v5 }
 0x30f   : > { %v2976_v54 = vpop.eup %2975  ;;  %2429 = vst.msk [vmem:[%s4014_s25 + $0x50] sm:$0xff] %vm2418_vm5, %v2974_v2 }
 0x310   : > { %v2400_v0 = vadd.f32 1.0, %v2976_v54 }
 0x312   : > { %v2978_v28 = vpop.eup %2977  ;;  %2985 = vrcp.f32 %v2400_v0 }
 0x313   : > { %v2980_v37 = vpop.eup %2979  ;;  %2430 = vst.msk [vmem:[%s4014_s25 + $0x58] sm:$0xff] %vm2418_vm5, %v2978_v28 }
 0x314   : > { %v2401_v52 = vadd.f32 1.0, %v2980_v37 }
 0x316   : > { %2987 = vrcp.f32 %v2401_v52 }
 0x317   : > { %v2982_v20 = vpop.eup %2981 }
 0x318   : > { %2431 = vst.msk [vmem:[%s4014_s25 + $0x60] sm:$0xff] %vm2418_vm5, %v2982_v20 }
 0x31b   : > { %v2984_v38 = vpop.eup %2983 }
 0x31c   : > { %2432 = vst.msk [vmem:[%s4014_s25 + $0x68] sm:$0xff] %vm2418_vm5, %v2984_v38 }
 0x31f   : > { %v2986_v49 = vpop.eup %2985 }
 0x320   : > { %2433 = vst.msk [vmem:[%s4014_s25 + $0x70] sm:$0xff] %vm2418_vm5, %v2986_v49 }
 0x323   : > { %v2988_v40 = vpop.eup %2987 }
 0x324   : > { %2434 = vst.msk [vmem:[%s4014_s25 + $0x78] sm:$0xff] %vm2418_vm5, %v2988_v40 }
 0x325 PF: > { %s21_s11 = sadd.s32 1, %s2995_s11  }
 0x326   : > { %p18_p4 = scmp.ge.s32.totalorder %s21_s11, 4  }
 0x328   :  { %20 = sbr.rel (!%p18_p4) target bundleno = 3 (0x3), region = 89 }

</bundles_post_ra>
